<compile_context>
chip_gen: v7x
topology: tpu7x:2x2x1
jax: 0.10.0
libtpu: 0.0.40
codegen_flags: <defaults>
</compile_context>

<pallas_src>
import functools

import numpy as np
import jax
import jax.numpy as jnp
from jax import lax
from jax.experimental import pallas as pl
from jax.experimental.pallas import tpu as pltpu

BN_EPS = 1e-5
MATMUL_DTYPE = jnp.bfloat16   # matmul operands; accumulation is always f32


# ---------------------------------------------------------------------------
# Parameter construction / preprocessing (init time, plain XLA / numpy)
# ---------------------------------------------------------------------------
def _make_conv_bn(key, k, cin, cout):
    """Synthetic conv weight + BN params; BN (inference) folded into (w, b)."""
    kw_, kg, kb, km, kv = jax.random.split(key, 5)
    w = jax.random.normal(kw_, (k, k, cin, cout), jnp.float32) * 0.05
    gamma = 1.0 + 0.1 * jax.random.normal(kg, (cout,), jnp.float32)
    beta = 0.1 * jax.random.normal(kb, (cout,), jnp.float32)
    mean = 0.1 * jax.random.normal(km, (cout,), jnp.float32)
    var = 0.9 + 0.1 * jnp.abs(jax.random.normal(kv, (cout,), jnp.float32))
    scale = gamma / jnp.sqrt(var + BN_EPS)
    return w * scale, beta - mean * scale


def _band_matrices(w, w_in, w_out, stride, pad):
    """Banded matmul weights for a conv along the flattened (W*C) lane axis.

    w: (KH, KW, Cin, Cout).  Returns band: (KH, w_in*Cin, w_out*Cout) with
      band[kh, iw*Cin+ci, ow*Cout+co] = w[kh, kw, ci, co], kw = iw - stride*ow + pad
    (zero elsewhere): the kw taps, the W stride and the W zero-padding become a
    single matmul per kh.
    """
    kh_, kw_, cin, cout = w.shape
    sel = np.zeros((kw_, w_in, w_out), np.float32)
    for kw in range(kw_):
        for ow in range(w_out):
            iw = stride * ow + kw - pad
            if 0 <= iw < w_in:
                sel[kw, iw, ow] = 1.0
    band = jnp.einsum("kio,hkcd->hicod", jnp.asarray(sel), w)
    return band.reshape(kh_, w_in * cin, w_out * cout)


def _stack_bands(band):
    """(KH, K, N) -> (KH*K, N) bf16: kh taps stacked along the contraction."""
    kh, kdim, ndim = band.shape
    return band.reshape(kh * kdim, ndim).astype(MATMUL_DTYPE)


def _tile_bias(b, w_out):
    """(Cout,) -> (1, w_out*Cout) matching the flattened (W*C) layout."""
    return jnp.tile(b, w_out)[None, :]


def _interp_matrix(out_size, in_size):
    """Dense 1-D bilinear interpolation matrix, align_corners=True (numpy)."""
    scale = (in_size - 1) / (out_size - 1) if out_size > 1 else 0.0
    m = np.zeros((out_size, in_size), np.float32)
    for o in range(out_size):
        src = o * scale
        i0 = min(max(int(np.floor(src)), 0), in_size - 1)
        i1 = min(i0 + 1, in_size - 1)
        frac = src - i0
        m[o, i0] += 1.0 - frac
        m[o, i1] += frac
    return m


def _pad_split_rows(x_flat):
    """Zero-pad H by 1 (top/bottom) and split even/odd rows (stride-2 convs)."""
    xp = jnp.pad(x_flat, ((0, 0), (1, 1), (0, 0)))
    return xp[:, 0::2, :], xp[:, 1::2, :]


def _pick_batch_block(n, target=8):
    """Largest divisor of n that is <= target (batch samples per grid step)."""
    nb = min(n, target)
    while n % nb:
        nb -= 1
    return nb


def _vmem_limit(args, out_bytes, scratch_bytes=0):
    """Explicit scoped-VMEM budget sized to the actual buffers (+headroom)."""
    in_bytes = sum(int(a.size) * a.dtype.itemsize for a in args)
    need = 2 * (in_bytes + out_bytes) + scratch_bytes + (4 << 20)
    return int(min(max(need, 16 << 20), 64 << 20))


# ---------------------------------------------------------------------------
# Branch kernel: all BasicBlocks of one branch, batch-blocked, VMEM-resident
# ---------------------------------------------------------------------------
def _make_branch_kernel(num_blocks, has_down, H, Nb, wc_in_list, wc_out):
    Hb = H + 2                 # padded rows per sample
    P = Nb * Hb                # padded rows per batch block

    def kernel(*refs):
        x_ref = refs[0]
        pad_ref = refs[-1]     # VMEM scratch (P + 2, wc_max) f32
        o_ref = refs[-2]
        wrefs = list(refs[1:-2])

        # Interior-row mask (1.0 on real rows, 0.0 on per-sample guard rows).
        ridx = lax.broadcasted_iota(jnp.int32, (P, 1), 0)
        interior = None
        for n in range(Nb):
            c = jnp.logical_and(ridx >= n * Hb + 1, ridx <= n * Hb + H)
            interior = c if interior is None else jnp.logical_or(interior, c)
        interior_f = interior.astype(jnp.float32)

        # Zero ONLY the guard rows (adjacent pairs at multiples of Hb), once.
        wc_max = pad_ref.shape[1]
        zrow = jnp.zeros((2, wc_max), jnp.float32)
        for k in range(Nb + 1):
            pad_ref[pl.ds(k * Hb, 2), pl.ds(0, wc_max)] = zrow

        # Stage the input batch block (interior rows only) into the scratch.
        wc0 = wc_in_list[0]
        for n in range(Nb):
            pad_ref[pl.ds(n * Hb + 2, H), pl.ds(0, wc0)] = (
                x_ref[n].astype(jnp.float32))

        def conv3x3(center, wc, band_ref, b_ref, relu):
            # `center` is the padded-row-space activation (P, wc); rows 1..P,
            # cols 0..wc of pad_ref hold the same data.  One matmul with
            # K = 3*wc covers all three kh taps (kh-stacked band matrix).
            lo = pad_ref[pl.ds(0, P), pl.ds(0, wc)]     # A[g-1] (kh=0)
            hi = pad_ref[pl.ds(2, P), pl.ds(0, wc)]     # A[g+1] (kh=2)
            s = jnp.concatenate(
                [lo.astype(MATMUL_DTYPE),
                 center.astype(MATMUL_DTYPE),
                 hi.astype(MATMUL_DTYPE)], axis=-1)     # (P, 3*wc)
            out = jnp.dot(s, band_ref[...], preferred_element_type=jnp.float32)
            out = out + b_ref[...]
            if relu:
                out = jnp.maximum(out, 0.0)
            return out * interior_f                     # kill guard rows

        # Block 0 input (padded space); guard rows are already zero.
        a = pad_ref[pl.ds(1, P), pl.ds(0, wc0)]

        pos = 0
        for blk in range(num_blocks):
            wc_in = wc_in_list[blk]
            band1, b1, band2, b2 = wrefs[pos:pos + 4]
            pos += 4
            if has_down[blk]:
                bandd, bd = wrefs[pos:pos + 2]
                pos += 2

            # conv1 (3x3, s1, p1) + BN + ReLU
            h1 = conv3x3(a, wc_in, band1, b1, relu=True)
            pad_ref[pl.ds(1, P), pl.ds(0, wc_out)] = h1
            # conv2 (3x3, s1, p1) + BN
            h2 = conv3x3(h1, wc_out, band2, b2, relu=False)

            # residual (identity or fused 1x1 conv + BN)
            if has_down[blk]:
                res = jnp.dot(a.astype(MATMUL_DTYPE), bandd[...],
                              preferred_element_type=jnp.float32) + bd[...]
            else:
                res = a
            a = jnp.maximum(h2 + res, 0.0) * interior_f
            if blk + 1 < num_blocks:
                pad_ref[pl.ds(1, P), pl.ds(0, wc_out)] = a

        # Extract interior rows -> (Nb, H, wc_out)
        for n in range(Nb):
            o_ref[n] = a[n * Hb + 1:n * Hb + 1 + H, :].astype(o_ref.dtype)

    return kernel


def branch_forward(blocks, x_flat, Nb):
    """Run all BasicBlocks of one branch in a single pallas_call.

    x_flat: (N, H, W*Cin) -> (N, H, W*Cout)."""
    N, H, WCin = x_flat.shape
    assert N % Nb == 0
    num_blocks = len(blocks)
    WCout = blocks[-1]["b2"].shape[1]
    wc_in_list = tuple(int(p["band1"].shape[0]) // 3 for p in blocks)
    has_down = tuple("bandd" in p for p in blocks)
    wc_max = max(wc_in_list + (WCout,))
    P = Nb * (H + 2)

    args = [x_flat]
    in_specs = [pl.BlockSpec((Nb, H, WCin), lambda n: (n, 0, 0))]
    for p in blocks:
        names = ["band1", "b1", "band2", "b2"]
        if "bandd" in p:
            names += ["bandd", "bd"]
        for name in names:
            arr = p[name]
            args.append(arr)
            in_specs.append(pl.BlockSpec(arr.shape, lambda n: (0, 0)))

    scratch_bytes = (P + 2) * wc_max * 4
    out_bytes = N * H * WCout * 4
    kernel = _make_branch_kernel(num_blocks, has_down, H, Nb, wc_in_list, WCout)
    return pl.pallas_call(
        kernel,
        out_shape=jax.ShapeDtypeStruct((N, H, WCout), x_flat.dtype),
        grid=(N // Nb,),
        in_specs=in_specs,
        out_specs=pl.BlockSpec((Nb, H, WCout), lambda n: (n, 0, 0)),
        scratch_shapes=[pltpu.VMEM((P + 2, wc_max), jnp.float32)],
        compiler_params=pltpu.CompilerParams(
            dimension_semantics=("parallel",),
            vmem_limit_bytes=_vmem_limit(args, out_bytes, scratch_bytes)),
    )(*args)


# ---------------------------------------------------------------------------
# Fuse-layer kernel: identity + upsample + downsample terms, SUM + ReLU
# ---------------------------------------------------------------------------
def _make_fuse_kernel(kinds, Nb):
    def kernel(*refs):
        o_ref = refs[-1]
        Hi, WCi = o_ref.shape[1], o_ref.shape[2]
        acc = None
        pos = 0
        for kind in kinds:
            if kind == "id":
                x_ref = refs[pos]
                pos += 1
                t = x_ref[...].astype(jnp.float32).reshape(
                    Nb * x_ref.shape[1], x_ref.shape[2])
            elif kind == "up":
                x_ref, m_ref, r_ref, b_ref = refs[pos:pos + 4]
                pos += 4
                hj, wcj = x_ref.shape[1], x_ref.shape[2]
                xb = x_ref[...].reshape(Nb * hj, wcj).astype(MATMUL_DTYPE)
                # 1x1 conv (+BN scale) fused with W interpolation, at M=Nb*hj.
                t = jnp.dot(xb, m_ref[...], preferred_element_type=jnp.float32)
                # H interpolation folded into one block-diagonal matmul.
                t = jnp.dot(r_ref[...], t.astype(MATMUL_DTYPE),
                            preferred_element_type=jnp.float32)
                t = t + b_ref[...]
            else:  # "down": stride-2 3x3 conv (+BN) from even/odd row phases
                ze_ref, zo_ref, band_ref, b_ref = refs[pos:pos + 4]
                pos += 4
                wc = ze_ref.shape[2]
                ze = ze_ref[...]
                zo = zo_ref[...]
                blk0 = ze[:, 0:Hi, :].reshape(Nb * Hi, wc)       # kh = 0
                blk1 = zo[:, 0:Hi, :].reshape(Nb * Hi, wc)       # kh = 1
                blk2 = ze[:, 1:Hi + 1, :].reshape(Nb * Hi, wc)   # kh = 2
                s = jnp.concatenate(
                    [blk0.astype(MATMUL_DTYPE),
                     blk1.astype(MATMUL_DTYPE),
                     blk2.astype(MATMUL_DTYPE)], axis=-1)
                t = jnp.dot(s, band_ref[...], preferred_element_type=jnp.float32)
                t = t + b_ref[...]
            acc = t if acc is None else acc + t
        out = jnp.maximum(acc, 0.0)
        o_ref[...] = out.reshape(Nb, Hi, WCi).astype(o_ref.dtype)

    return kernel


def downsample_step(t, band_stack, bias, Nb):
    """One intermediate stride-2 3x3 conv + BN + ReLU of a fuse chain."""
    N, H, WC = t.shape
    Ho = H // 2
    WCout = band_stack.shape[1]
    ze, zo = _pad_split_rows(t)
    out_bytes = N * Ho * WCout * 4
    return pl.pallas_call(
        _make_fuse_kernel(("down",), Nb),
        out_shape=jax.ShapeDtypeStruct((N, Ho, WCout), t.dtype),
        grid=(N // Nb,),
        in_specs=[
            pl.BlockSpec((Nb, Ho + 1, WC), lambda n: (n, 0, 0)),
            pl.BlockSpec((Nb, Ho + 1, WC), lambda n: (n, 0, 0)),
            pl.BlockSpec(band_stack.shape, lambda n: (0, 0)),
            pl.BlockSpec(bias.shape, lambda n: (0, 0)),
        ],
        out_specs=pl.BlockSpec((Nb, Ho, WCout), lambda n: (n, 0, 0)),
        compiler_params=pltpu.CompilerParams(
            dimension_semantics=("parallel",),
            vmem_limit_bytes=_vmem_limit([ze, zo, band_stack, bias], out_bytes)),
    )(ze, zo, band_stack, bias)


# ---------------------------------------------------------------------------
# Module glue
# ---------------------------------------------------------------------------
class HighResolutionModulePallas:
    """Pallas re-implementation of HighResolutionModule (BasicBlock,
    expansion=1, fuse_method='SUM', inference BN, bilinear align_corners=True
    upsampling in the fuse layers, per the reference module)."""

    def __init__(self, key, num_branches, num_blocks, num_inchannels,
                 num_channels, spatial_hw, multi_scale_output=True):
        assert num_branches == len(num_blocks) == len(num_channels) == len(num_inchannels)
        expansion = 1
        self.num_branches = num_branches
        self.multi_scale_output = multi_scale_output
        self.num_inchannels = list(num_inchannels)
        self.spatial = [(spatial_hw[0] // (2 ** k), spatial_hw[1] // (2 ** k))
                        for k in range(num_branches)]

        # branches: sequences of fused BasicBlocks
        self.branches = []
        for i in range(num_branches):
            Wb = self.spatial[i][1]
            blocks = []
            cin = self.num_inchannels[i]
            cout = num_channels[i] * expansion
            for _ in range(num_blocks[i]):
                key, k1, k2, k3 = jax.random.split(key, 4)
                w1, b1 = _make_conv_bn(k1, 3, cin, cout)
                w2, b2 = _make_conv_bn(k2, 3, cout, cout)
                p = {
                    "band1": _stack_bands(_band_matrices(w1, Wb, Wb, 1, 1)),
                    "b1": _tile_bias(b1, Wb),
                    "band2": _stack_bands(_band_matrices(w2, Wb, Wb, 1, 1)),
                    "b2": _tile_bias(b2, Wb),
                }
                if cin != cout:  # stride is always 1 inside _make_one_branch
                    wd, bd = _make_conv_bn(k3, 1, cin, cout)
                    p["bandd"] = _stack_bands(_band_matrices(wd, Wb, Wb, 1, 0))
                    p["bd"] = _tile_bias(bd, Wb)
                blocks.append(p)
                cin = cout
            self.num_inchannels[i] = cout
            self.branches.append(blocks)

        # fuse layers
        self.fuse_layers = None
        if num_branches > 1:
            n_out = num_branches if multi_scale_output else 1
            fl = []
            for i in range(n_out):
                Hi, Wi = self.spatial[i]
                Ci = self.num_inchannels[i]
                row = []
                for j in range(num_branches):
                    hj, wj = self.spatial[j]
                    Cj = self.num_inchannels[j]
                    if j > i:
                        key, sub = jax.random.split(key)
                        wc, bc = _make_conv_bn(sub, 1, Cj, Ci)
                        a_w = _interp_matrix(Wi, wj)          # np (Wi, wj)
                        m = jnp.einsum("ow,cd->wcod", jnp.asarray(a_w), wc[0, 0])
                        row.append({
                            "kind": "up",
                            "R": _interp_matrix(Hi, hj),      # np (Hi, hj)
                            "M": m.reshape(wj * Cj, Wi * Ci).astype(MATMUL_DTYPE),
                            "b": _tile_bias(bc, Wi),
                        })
                    elif j == i:
                        row.append({"kind": "id"})
                    else:
                        convs = []
                        w_cur, c_cur = wj, Cj
                        for k in range(i - j):
                            key, sub = jax.random.split(key)
                            last = (k == i - j - 1)
                            c_out = Ci if last else Cj
                            w3, b3 = _make_conv_bn(sub, 3, c_cur, c_out)
                            convs.append({
                                "band": _stack_bands(
                                    _band_matrices(w3, w_cur, w_cur // 2, 2, 1)),
                                "b": _tile_bias(b3, w_cur // 2),
                            })
                            w_cur //= 2
                            c_cur = c_out
                        row.append({"kind": "down", "convs": convs})
                fl.append(row)
            self.fuse_layers = fl

    def __call__(self, xs):
        """xs: list of NHWC arrays (one per branch) -> list of NHWC arrays."""
        assert len(xs) == self.num_branches
        N = xs[0].shape[0]
        Nb = _pick_batch_block(N)
        flat = [x.reshape(N, x.shape[1], x.shape[2] * x.shape[3]) for x in xs]

        # branches (whole block chain of a branch in one pallas_call)
        for i in range(self.num_branches):
            flat[i] = branch_forward(self.branches[i], flat[i], Nb)

        if self.num_branches == 1:
            H, W = self.spatial[0]
            return [flat[0].reshape(N, H, W, self.num_inchannels[0])]

        # fuse: one fused kernel per output branch
        outs = []
        for i in range(len(self.fuse_layers)):
            Hi, Wi = self.spatial[i]
            Ci = self.num_inchannels[i]
            kinds, args, in_specs = [], [], []
            for j in range(self.num_branches):
                spec_j = self.fuse_layers[i][j]
                hj, wj = self.spatial[j]
                Cj = self.num_inchannels[j]
                if spec_j["kind"] == "id":
                    kinds.append("id")
                    args.append(flat[j])
                    in_specs.append(
                        pl.BlockSpec((Nb, hj, wj * Cj), lambda n: (n, 0, 0)))
                elif spec_j["kind"] == "up":
                    kinds.append("up")
                    rblk = jnp.asarray(
                        np.kron(np.eye(Nb, dtype=np.float32), spec_j["R"]),
                        MATMUL_DTYPE)
                    args += [flat[j], spec_j["M"], rblk, spec_j["b"]]
                    in_specs += [
                        pl.BlockSpec((Nb, hj, wj * Cj), lambda n: (n, 0, 0)),
                        pl.BlockSpec(spec_j["M"].shape, lambda n: (0, 0)),
                        pl.BlockSpec(rblk.shape, lambda n: (0, 0)),
                        pl.BlockSpec(spec_j["b"].shape, lambda n: (0, 0)),
                    ]
                else:  # "down"
                    kinds.append("down")
                    t = flat[j]
                    for c in spec_j["convs"][:-1]:
                        t = downsample_step(t, c["band"], c["b"], Nb)
                    last = spec_j["convs"][-1]
                    ze, zo = _pad_split_rows(t)
                    args += [ze, zo, last["band"], last["b"]]
                    in_specs += [
                        pl.BlockSpec((Nb,) + ze.shape[1:], lambda n: (n, 0, 0)),
                        pl.BlockSpec((Nb,) + zo.shape[1:], lambda n: (n, 0, 0)),
                        pl.BlockSpec(last["band"].shape, lambda n: (0, 0)),
                        pl.BlockSpec(last["b"].shape, lambda n: (0, 0)),
                    ]
            out_bytes = N * Hi * Wi * Ci * 4
            out = pl.pallas_call(
                _make_fuse_kernel(tuple(kinds), Nb),
                out_shape=jax.ShapeDtypeStruct((N, Hi, Wi * Ci), flat[i].dtype),
                grid=(N // Nb,),
                in_specs=in_specs,
                out_specs=pl.BlockSpec((Nb, Hi, Wi * Ci), lambda n: (n, 0, 0)),
                compiler_params=pltpu.CompilerParams(
                    dimension_semantics=("parallel",),
                    vmem_limit_bytes=_vmem_limit(args, out_bytes)),
            )(*args)
            outs.append(out.reshape(N, Hi, Wi, Ci))
        return outs


# ---------------------------------------------------------------------------
if __name__ == "__main__":
    key = jax.random.PRNGKey(0)
    N = 2
    num_branches = 2
    num_blocks = [1, 1]
    num_inchannels = [16, 32]
    num_channels = [16, 32]
    H0, W0 = 16, 16

    k_in0, k_in1, k_mod = jax.random.split(key, 3)
    # PyTorch reference inputs are NCHW; the Pallas kernels use NHWC (W*C fused
    # into a lane-dense last axis).
    x0_nchw = jax.random.normal(k_in0, (N, num_inchannels[0], H0, W0), jnp.float32)
    x1_nchw = jax.random.normal(k_in1, (N, num_inchannels[1], H0 // 2, W0 // 2),
                                jnp.float32)
    x0 = jnp.transpose(x0_nchw, (0, 2, 3, 1))
    x1 = jnp.transpose(x1_nchw, (0, 2, 3, 1))

    module = HighResolutionModulePallas(
        k_mod, num_branches, num_blocks, num_inchannels, num_channels,
        spatial_hw=(H0, W0), multi_scale_output=True)

    outs = module([x0, x1])
    outs = [jax.block_until_ready(o) for o in outs]

    assert outs[0].shape == (N, H0, W0, num_channels[0]), outs[0].shape
    assert outs[1].shape == (N, H0 // 2, W0 // 2, num_channels[1]), outs[1].shape
    assert all(bool(jnp.all(jnp.isfinite(o))) for o in outs)
    assert all(bool(jnp.all(o >= 0.0)) for o in outs)  # final ReLU

    print("KERNEL_OK")
</pallas_src>

<mosaic_0001>
module attributes {stable_mosaic.version = 11 : i64} {
  func.func @kernel(%arg0: i32, %arg1: memref<2x16x256xf32, #tpu.memory_space<vmem>>, %arg2: memref<768x256xbf16, #tpu.memory_space<vmem>>, %arg3: memref<1x256xf32, #tpu.memory_space<vmem>>, %arg4: memref<768x256xbf16, #tpu.memory_space<vmem>>, %arg5: memref<1x256xf32, #tpu.memory_space<vmem>>, %arg6: memref<2x16x256xf32, #tpu.memory_space<vmem>>, %arg7: memref<38x256xf32, #tpu.memory_space<vmem>>) attributes {dimension_semantics = [#tpu.dimension_semantics<parallel>], iteration_bounds = array<i64: 1>, scalar_prefetch = 0 : i64, scratch_operands = 1 : i64, tpu.core_type = #tpu.core_type<tc>, window_params = [{transform_indices = @transform_0, window_bounds = array<i64: 2, 16, 256>}, {pipeline_mode = #tpu.pipeline_mode<synchronous>, transform_indices = @transform_1, window_bounds = array<i64: 768, 256>}, {pipeline_mode = #tpu.pipeline_mode<synchronous>, transform_indices = @transform_2, window_bounds = array<i64: 1, 256>}, {pipeline_mode = #tpu.pipeline_mode<synchronous>, transform_indices = @transform_3, window_bounds = array<i64: 768, 256>}, {pipeline_mode = #tpu.pipeline_mode<synchronous>, transform_indices = @transform_4, window_bounds = array<i64: 1, 256>}, {transform_indices = @transform_5, window_bounds = array<i64: 2, 16, 256>}]} {
    %0 = tpu.iota {dimensions = array<i32: 0>} : vector<36x1xi32>
    %c1_i32 = arith.constant 1 : i32
    %1 = vector.broadcast %c1_i32 : i32 to vector<36x1xi32>
    %2 = arith.cmpi sge, %0, %1 : vector<36x1xi32>
    %c16_i32 = arith.constant 16 : i32
    %3 = vector.broadcast %c16_i32 : i32 to vector<36x1xi32>
    %4 = arith.cmpi sle, %0, %3 : vector<36x1xi32>
    %5 = arith.andi %2, %4 : vector<36x1xi1>
    %c19_i32 = arith.constant 19 : i32
    %6 = vector.broadcast %c19_i32 : i32 to vector<36x1xi32>
    %7 = arith.cmpi sge, %0, %6 : vector<36x1xi32>
    %c34_i32 = arith.constant 34 : i32
    %8 = vector.broadcast %c34_i32 : i32 to vector<36x1xi32>
    %9 = arith.cmpi sle, %0, %8 : vector<36x1xi32>
    %10 = arith.andi %7, %9 : vector<36x1xi1>
    %11 = arith.ori %5, %10 : vector<36x1xi1>
    %12 = arith.extui %11 : vector<36x1xi1> to vector<36x1xi32>
    %13 = arith.sitofp %12 : vector<36x1xi32> to vector<36x1xf32>
    %cst = arith.constant 0.000000e+00 : f32
    %14 = vector.broadcast %cst : f32 to vector<2x256xf32>
    %c0 = arith.constant 0 : index
    %c0_0 = arith.constant 0 : index
    %15 = vector.load %arg7[%c0, %c0_0] : memref<38x256xf32, #tpu.memory_space<vmem>>, vector<2x256xf32>
    tpu.vector_store %arg7[%c0, %c0_0], %14 {strides = array<i32>} : memref<38x256xf32, #tpu.memory_space<vmem>>, vector<2x256xf32>,
    %c18 = arith.constant 18 : index
    %c0_1 = arith.constant 0 : index
    %16 = vector.load %arg7[%c18, %c0_1] : memref<38x256xf32, #tpu.memory_space<vmem>>, vector<2x256xf32>
    tpu.vector_store %arg7[%c18, %c0_1], %14 {strides = array<i32>} : memref<38x256xf32, #tpu.memory_space<vmem>>, vector<2x256xf32>,
    %c36 = arith.constant 36 : index
    %c0_2 = arith.constant 0 : index
    %17 = vector.load %arg7[%c36, %c0_2] : memref<38x256xf32, #tpu.memory_space<vmem>>, vector<2x256xf32>
    tpu.vector_store %arg7[%c36, %c0_2], %14 {strides = array<i32>} : memref<38x256xf32, #tpu.memory_space<vmem>>, vector<2x256xf32>,
    %c0_3 = arith.constant 0 : index
    %c0_4 = arith.constant 0 : index
    %c0_5 = arith.constant 0 : index
    %18 = vector.load %arg1[%c0_3, %c0_4, %c0_5] : memref<2x16x256xf32, #tpu.memory_space<vmem>>, vector<1x16x256xf32>
    %19 = vector.shape_cast %18 : vector<1x16x256xf32> to vector<16x256xf32>
    %c2 = arith.constant 2 : index
    %c0_6 = arith.constant 0 : index
    %20 = vector.load %arg7[%c2, %c0_6] : memref<38x256xf32, #tpu.memory_space<vmem>>, vector<16x256xf32>
    tpu.vector_store %arg7[%c2, %c0_6], %19 {strides = array<i32>} : memref<38x256xf32, #tpu.memory_space<vmem>>, vector<16x256xf32>,
    %c1 = arith.constant 1 : index
    %c0_7 = arith.constant 0 : index
    %c0_8 = arith.constant 0 : index
    %21 = vector.load %arg1[%c1, %c0_7, %c0_8] : memref<2x16x256xf32, #tpu.memory_space<vmem>>, vector<1x16x256xf32>
    %22 = vector.shape_cast %21 : vector<1x16x256xf32> to vector<16x256xf32>
    %c20 = arith.constant 20 : index
    %c0_9 = arith.constant 0 : index
    %23 = vector.load %arg7[%c20, %c0_9] : memref<38x256xf32, #tpu.memory_space<vmem>>, vector<16x256xf32>
    tpu.vector_store %arg7[%c20, %c0_9], %22 {strides = array<i32>} : memref<38x256xf32, #tpu.memory_space<vmem>>, vector<16x256xf32>,
    %c1_10 = arith.constant 1 : index
    %c0_11 = arith.constant 0 : index
    %24 = vector.load %arg7[%c1_10, %c0_11] : memref<38x256xf32, #tpu.memory_space<vmem>>, vector<36x256xf32>
    %c0_12 = arith.constant 0 : index
    %c0_13 = arith.constant 0 : index
    %25 = vector.load %arg7[%c0_12, %c0_13] : memref<38x256xf32, #tpu.memory_space<vmem>>, vector<36x256xf32>
    %c2_14 = arith.constant 2 : index
    %c0_15 = arith.constant 0 : index
    %26 = vector.load %arg7[%c2_14, %c0_15] : memref<38x256xf32, #tpu.memory_space<vmem>>, vector<36x256xf32>
    %27 = arith.truncf %25 : vector<36x256xf32> to vector<36x256xbf16>
    %28 = arith.truncf %24 : vector<36x256xf32> to vector<36x256xbf16>
    %29 = arith.truncf %26 : vector<36x256xf32> to vector<36x256xbf16>
    %30 = tpu.concatenate %27, %28, %29 in 1 : vector<36x256xbf16>, vector<36x256xbf16>, vector<36x256xbf16> -> vector<36x768xbf16>
    %c0_16 = arith.constant 0 : index
    %c0_17 = arith.constant 0 : index
    %31 = vector.load %arg2[%c0_16, %c0_17] : memref<768x256xbf16, #tpu.memory_space<vmem>>, vector<768x256xbf16>
    %cst_18 = arith.constant dense<0.000000e+00> : vector<36x256xf32>
    %32 = tpu.matmul %30, %31, %cst_18 {dimension_numbers = #tpu.dot_dimension_numbers<[1], [0], [0], [1], [0, 0, 1, 1], [], []>} : vector<36x768xbf16>, vector<768x256xbf16>, vector<36x256xf32> -> vector<36x256xf32>
    %c0_19 = arith.constant 0 : index
    %c0_20 = arith.constant 0 : index
    %33 = vector.load %arg3[%c0_19, %c0_20] : memref<1x256xf32, #tpu.memory_space<vmem>>, vector<1x256xf32>
    %34 = vector.broadcast %33 : vector<1x256xf32> to vector<36x256xf32>
    %35 = arith.addf %32, %34 : vector<36x256xf32>
    %cst_21 = arith.constant 0.000000e+00 : f32
    %36 = vector.broadcast %cst_21 : f32 to vector<36x256xf32>
    %37 = arith.maximumf %35, %36 : vector<36x256xf32>
    %38 = vector.broadcast %13 : vector<36x1xf32> to vector<36x256xf32>
    %39 = arith.mulf %37, %38 : vector<36x256xf32>
    %c1_22 = arith.constant 1 : index
    %c0_23 = arith.constant 0 : index
    %40 = vector.load %arg7[%c1_22, %c0_23] : memref<38x256xf32, #tpu.memory_space<vmem>>, vector<36x256xf32>
    tpu.vector_store %arg7[%c1_22, %c0_23], %39 {strides = array<i32>} : memref<38x256xf32, #tpu.memory_space<vmem>>, vector<36x256xf32>,
    %c0_24 = arith.constant 0 : index
    %c0_25 = arith.constant 0 : index
    %41 = vector.load %arg7[%c0_24, %c0_25] : memref<38x256xf32, #tpu.memory_space<vmem>>, vector<36x256xf32>
    %c2_26 = arith.constant 2 : index
    %c0_27 = arith.constant 0 : index
    %42 = vector.load %arg7[%c2_26, %c0_27] : memref<38x256xf32, #tpu.memory_space<vmem>>, vector<36x256xf32>
    %43 = arith.truncf %41 : vector<36x256xf32> to vector<36x256xbf16>
    %44 = arith.truncf %39 : vector<36x256xf32> to vector<36x256xbf16>
    %45 = arith.truncf %42 : vector<36x256xf32> to vector<36x256xbf16>
    %46 = tpu.concatenate %43, %44, %45 in 1 : vector<36x256xbf16>, vector<36x256xbf16>, vector<36x256xbf16> -> vector<36x768xbf16>
    %c0_28 = arith.constant 0 : index
    %c0_29 = arith.constant 0 : index
    %47 = vector.load %arg4[%c0_28, %c0_29] : memref<768x256xbf16, #tpu.memory_space<vmem>>, vector<768x256xbf16>
    %cst_30 = arith.constant dense<0.000000e+00> : vector<36x256xf32>
    %48 = tpu.matmul %46, %47, %cst_30 {dimension_numbers = #tpu.dot_dimension_numbers<[1], [0], [0], [1], [0, 0, 1, 1], [], []>} : vector<36x768xbf16>, vector<768x256xbf16>, vector<36x256xf32> -> vector<36x256xf32>
    %c0_31 = arith.constant 0 : index
    %c0_32 = arith.constant 0 : index
    %49 = vector.load %arg5[%c0_31, %c0_32] : memref<1x256xf32, #tpu.memory_space<vmem>>, vector<1x256xf32>
    %50 = vector.broadcast %49 : vector<1x256xf32> to vector<36x256xf32>
    %51 = arith.addf %48, %50 : vector<36x256xf32>
    %52 = vector.broadcast %13 : vector<36x1xf32> to vector<36x256xf32>
    %53 = arith.mulf %51, %52 : vector<36x256xf32>
    %54 = arith.addf %53, %24 : vector<36x256xf32>
    %cst_33 = arith.constant 0.000000e+00 : f32
    %55 = vector.broadcast %cst_33 : f32 to vector<36x256xf32>
    %56 = arith.maximumf %54, %55 : vector<36x256xf32>
    %57 = vector.broadcast %13 : vector<36x1xf32> to vector<36x256xf32>
    %58 = arith.mulf %56, %57 : vector<36x256xf32>
    %59 = vector.extract_strided_slice %58 {offsets = [1, 0], sizes = [16, 256], strides = [1, 1]} : vector<36x256xf32> to vector<16x256xf32>
    %c0_34 = arith.constant 0 : index
    %c0_35 = arith.constant 0 : index
    %c0_36 = arith.constant 0 : index
    %60 = vector.load %arg6[%c0_34, %c0_35, %c0_36] : memref<2x16x256xf32, #tpu.memory_space<vmem>>, vector<1x16x256xf32>
    %61 = vector.shape_cast %60 : vector<1x16x256xf32> to vector<16x256xf32>
    %62 = vector.shape_cast %59 : vector<16x256xf32> to vector<1x16x256xf32>
    tpu.vector_store %arg6[%c0_34, %c0_35, %c0_36], %62 {strides = array<i32>} : memref<2x16x256xf32, #tpu.memory_space<vmem>>, vector<1x16x256xf32>,
    %63 = vector.extract_strided_slice %58 {offsets = [19, 0], sizes = [16, 256], strides = [1, 1]} : vector<36x256xf32> to vector<16x256xf32>
    %c1_37 = arith.constant 1 : index
    %c0_38 = arith.constant 0 : index
    %c0_39 = arith.constant 0 : index
    %64 = vector.load %arg6[%c1_37, %c0_38, %c0_39] : memref<2x16x256xf32, #tpu.memory_space<vmem>>, vector<1x16x256xf32>
    %65 = vector.shape_cast %64 : vector<1x16x256xf32> to vector<16x256xf32>
    %66 = vector.shape_cast %63 : vector<16x256xf32> to vector<1x16x256xf32>
    tpu.vector_store %arg6[%c1_37, %c0_38, %c0_39], %66 {strides = array<i32>} : memref<2x16x256xf32, #tpu.memory_space<vmem>>, vector<1x16x256xf32>,
    return
  }
  func.func @transform_0(%arg0: i32) -> (i32, i32, i32) {
    %c0_i32 = arith.constant 0 : i32
    %c0_i32_0 = arith.constant 0 : i32
    %c0_i32_1 = arith.constant 0 : i32
    return %arg0, %c0_i32, %c0_i32_0 : i32, i32, i32
  }
  func.func @transform_1(%arg0: i32) -> (i32, i32) {
    %c0_i32 = arith.constant 0 : i32
    %c0_i32_0 = arith.constant 0 : i32
    %c0_i32_1 = arith.constant 0 : i32
    return %c0_i32, %c0_i32_0 : i32, i32
  }
  func.func @transform_2(%arg0: i32) -> (i32, i32) {
    %c0_i32 = arith.constant 0 : i32
    %c0_i32_0 = arith.constant 0 : i32
    %c0_i32_1 = arith.constant 0 : i32
    return %c0_i32, %c0_i32_0 : i32, i32
  }
  func.func @transform_3(%arg0: i32) -> (i32, i32) {
    %c0_i32 = arith.constant 0 : i32
    %c0_i32_0 = arith.constant 0 : i32
    %c0_i32_1 = arith.constant 0 : i32
    return %c0_i32, %c0_i32_0 : i32, i32
  }
  func.func @transform_4(%arg0: i32) -> (i32, i32) {
    %c0_i32 = arith.constant 0 : i32
    %c0_i32_0 = arith.constant 0 : i32
    %c0_i32_1 = arith.constant 0 : i32
    return %c0_i32, %c0_i32_0 : i32, i32
  }
  func.func @transform_5(%arg0: i32) -> (i32, i32, i32) {
    %c0_i32 = arith.constant 0 : i32
    %c0_i32_0 = arith.constant 0 : i32
    %c0_i32_1 = arith.constant 0 : i32
    return %arg0, %c0_i32, %c0_i32_0 : i32, i32, i32
  }
}

</mosaic_0001>

<bundles_post_ra>
// kernel: tpu_custom_call.1
= control target key start
LH: loop header
LB: loop body
LE: loop exit
PB: predicated region body
PF: predicated region fallthrough
CT: control target
= control target key end

     0   :  { %10 = vsyncpa [#allocation4], 0  ;;  %s3081_s0 = inlined_call_operand.hbm [shape: f32[2,16,256], index: 0, kind: input, shape index: {}]   ;;  %s3082_s1 = inlined_call_operand.hbm [shape: bf16[768,256], index: 1, kind: input, shape index: {}]   ;;  %s3083_s2 = inlined_call_operand.vmem [shape: f32[1,256], index: 2, kind: input, shape index: {}]   ;;  %s3084_s3 = inlined_call_operand.hbm [shape: bf16[768,256], index: 3, kind: input, shape index: {}]   ;;  %s3085_s4 = inlined_call_operand.vmem [shape: f32[1,256], index: 4, kind: input, shape index: {}]   ;;  %s3086_s5 = inlined_call_operand.hbm [shape: f32[2,16,256], index: 5, kind: output, shape index: {}]  }
   0x1   :  { %11 = vsyncpa [#allocation7], 0 }
   0x2   :  { %12 = vsyncpa [#allocation5], 0  ;;  %s2744_s18 = smov [#allocation6]   ;;  %s2650_s22 = scalar_lea.hbm %s3082_s1, 12288 }
   0x3   :  { %s30_s19 = sshll.u32 %s2744_s18, 4  ;;  %p2651_p0 = scmp.ne.s32.totalorder %s3082_s1, %s2650_s22  ;;  %s31_s19 = int_to_ptr.vmem [resolvable:$true] %s30_s19 }
   0x4   :  { %p2654_p1 = scmp.lt.u32.totalorder %s2650_s22, %s3082_s1 }
   0x6   :  { %p2656_p2 = pnand %p2654_p1, %p2651_p0 }
   0x8   :  { %2659 = shalt.err (!%p2656_p2)
}
   0x9   :  { %s2660_s27 = scalar_lea.vmem %s31_s19, 12288  ;;  %p2665_p4 = scmp.lt.s32.totalorder %s31_s19, %s31_s19 }
   0xa   :  { %p2661_p3 = scmp.ne.s32.totalorder %s31_s19, %s2660_s27  ;;  %p2666_p5 = scmp.lt.s32.totalorder %s2660_s27, %s2660_s27 }
   0xc   :  { %p2667_p6 = por %p2666_p5, %p2665_p4 }
   0xe   :  { %p2668_p7 = pnand %p2667_p6, %p2661_p3 }
  0x10   :  { %2671 = shalt.err (!%p2668_p7)
}
  0x11   :  { %s2745_s28 = smov 128   ;;  %s2746_s29 = smov 8  }
  0x12   :  { %36 = dma.hbm_to_vmem [thread:$0]  %s3082_s1, 12288, %s31_s19, [#allocation7], %s2745_s28, %s2745_s28, %s2746_s29  }
  0x13   :  { %s2747_s7 = smov [#allocation3]   ;;  %s2672_s11 = scalar_lea.hbm %s3081_s0, 1024 }
  0x14   :  { %s18_s8 = sshll.u32 %s2747_s7, 4  ;;  %p2673_p8 = scmp.ne.s32.totalorder %s3081_s0, %s2672_s11  ;;  %s19_s8 = int_to_ptr.vmem [resolvable:$true] %s18_s8 }
  0x15   :  { %p2676_p9 = scmp.lt.u32.totalorder %s2672_s11, %s3081_s0 }
  0x17   :  { %p2678_p10 = pnand %p2676_p9, %p2673_p8 }
  0x19   :  { %2681 = shalt.err (!%p2678_p10)
}
  0x1a   :  { %s2682_s16 = scalar_lea.vmem %s19_s8, 1024  ;;  %p2687_p12 = scmp.lt.s32.totalorder %s19_s8, %s19_s8 }
  0x1b   :  { %p2683_p11 = scmp.ne.s32.totalorder %s19_s8, %s2682_s16  ;;  %p2688_p13 = scmp.lt.s32.totalorder %s2682_s16, %s2682_s16 }
  0x1d   :  { %p2689_p0 = por %p2688_p13, %p2687_p12 }
  0x1f   :  { %p2690_p1 = pnand %p2689_p0, %p2683_p11 }
  0x21   :  { %2693 = shalt.err (!%p2690_p1)
}
  0x22   :  { %s2748_s1 = smov 256   ;;  %s2749_s17 = smov 16  }
  0x23   :  { %24 = dma.hbm_to_vmem [thread:$0]  %s3081_s0, 1024, %s19_s8, [#allocation4], %s2748_s1, %s2748_s1, %s2749_s17  }
  0x24   :  { %s2750_s20 = smov [#allocation8]   ;;  %s2694_s24 = scalar_lea.hbm %s3084_s3, 12288 }
  0x25   :  { %s44_s21 = sshll.u32 %s2750_s20, 4  ;;  %p2695_p2 = scmp.ne.s32.totalorder %s3084_s3, %s2694_s24  ;;  %s45_s21 = int_to_ptr.vmem [resolvable:$true] %s44_s21 }
  0x26   :  { %p2698_p3 = scmp.lt.u32.totalorder %s2694_s24, %s3084_s3 }
  0x28   :  { %p2700_p4 = pnand %p2698_p3, %p2695_p2 }
  0x2a   :  { %2703 = shalt.err (!%p2700_p4)
}
  0x2b   :  { %s2704_s6 = scalar_lea.vmem %s45_s21, 12288  ;;  %p2709_p6 = scmp.lt.s32.totalorder %s45_s21, %s45_s21 }
  0x2c   :  { %p2705_p5 = scmp.ne.s32.totalorder %s45_s21, %s2704_s6  ;;  %p2710_p7 = scmp.lt.s32.totalorder %s2704_s6, %s2704_s6 }
  0x2e   :  { %p2711_p8 = por %p2710_p7, %p2709_p6 }
  0x30   :  { %p2712_p9 = pnand %p2711_p8, %p2705_p5 }
  0x32   :  { %2715 = shalt.err (!%p2712_p9)
}
  0x33   :  { %50 = dma.hbm_to_vmem [thread:$0]  %s3084_s3, 12288, %s45_s21, [#allocation7], %s2745_s28, %s2745_s28, %s2746_s29  }
  0x34   :  { %2738 = dma.done.wait [#allocation4], 1024  }
  0x35   :  { %2739 = vsyncadd [#allocation4], 4294966272 }
  0x36   :  { %2740 = dma.done.wait [#allocation7], 24576  }
  0x37   :  { %2741 = vsyncadd [#allocation7], 4294942720  ;;  %v2751_v0 = vmov 0.0   ;;  %v2362_v1 = vld [vmem:[#allocation6 + $0x4] ss:$8 sps:$4 sm:$0xff]   ;;  %v122_v15 = vld [vmem:[#allocation3 + $0x18] sm:$0xff] }
  0x38   :  { %114 = vst [vmem:[#allocation2 + $0x8] sm:$0x3] %v2751_v0  ;;  %113 = vst [vmem:[#allocation2] sm:$0x3] %v2751_v0  ;;  %v2364_v2 = vld [vmem:[#allocation6] ss:$8 sps:$4 sm:$0xff]   ;;  %870 = vmatprep.subr.bf16.mxu0 %v2362_v1 }
  0x39   :  { %115 = vst [vmem:[#allocation2 + $0x20] sm:$0xc] %v2751_v0  ;;  %116 = vst [vmem:[#allocation2 + $0x28] sm:$0xc] %v2751_v0  ;;  %v2365_v3 = vld [vmem:[#allocation6 + $0x14] ss:$8 sps:$4 sm:$0xff]   ;;  %871 = vmatpush1.bf16.msra.mxu0 %v2364_v2 }
  0x3a   :  { %117 = vst [vmem:[#allocation2 + $0x40] sm:$0x30] %v2751_v0  ;;  %118 = vst [vmem:[#allocation2 + $0x48] sm:$0x30] %v2751_v0  ;;  %v2367_v4 = vld [vmem:[#allocation6 + $0x10] ss:$8 sps:$4 sm:$0xff]   ;;  %872 = vmatprep.subr.bf16.mxu0 %v2365_v3 }
  0x3b   :  { %v2368_v5 = vld [vmem:[#allocation6 + $0x24] ss:$8 sps:$4 sm:$0xff]   ;;  %v2370_v6 = vld [vmem:[#allocation6 + $0x20] ss:$8 sps:$4 sm:$0xff]   ;;  %v2371_v7 = vld [vmem:[#allocation6 + $0x34] ss:$8 sps:$4 sm:$0xff]  }
  0x3c   :  { %v2373_v8 = vld [vmem:[#allocation6 + $0x30] ss:$8 sps:$4 sm:$0xff]   ;;  %v2374_v9 = vld [vmem:[#allocation6 + $0x44] ss:$8 sps:$4 sm:$0xff]   ;;  %v2376_v10 = vld [vmem:[#allocation6 + $0x40] ss:$8 sps:$4 sm:$0xff]  }
  0x3d   :  { %873 = vmatpush1.bf16.msra.mxu0 %v2367_v4  ;;  %v2377_v11 = vld [vmem:[#allocation6 + $0x54] ss:$8 sps:$4 sm:$0xff]   ;;  %v2379_v12 = vld [vmem:[#allocation6 + $0x50] ss:$8 sps:$4 sm:$0xff]   ;;  %v2380_v13 = vld [vmem:[#allocation6 + $0x64] ss:$8 sps:$4 sm:$0xff]  }
  0x3e   :  { %874 = vmatprep.subr.bf16.mxu0 %v2368_v5  ;;  %v120_v14 = vld [vmem:[#allocation3 + $0x8] sm:$0xff]  ;;  %v132_v17 = vrot.slane %v122_v15, 6  ;;  %v2834_v19 = vld [vmem:[#allocation3] sm:$0xff]  ;;  %v2836_v20 = vld [vmem:[#allocation3 + $0x10] sm:$0xff]  ;;  %vm127_vm0 = vcmask 1041408   ;;  %vm155_vm1 = vcmask 1043456  }
  0x3f   :  { %v129_v16 = vrot.slane %v120_v14, 6  ;;  %v2382_v18 = vld [vmem:[#allocation6 + $0x60] ss:$8 sps:$4 sm:$0xff]   ;;  %v2383_v21 = vld [vmem:[#allocation6 + $0x74] ss:$8 sps:$4 sm:$0xff]   ;;  %v128_v22 = vrot.slane %v2834_v19, 6 }
  0x40   :  { %145 = vst [vmem:[#allocation2 + $0x28] sm:$0x3] %v132_v17  ;;  %v130_v23 = vrot.slane %v2836_v20, 6  ;;  %v2385_v24 = vld [vmem:[#allocation6 + $0x70] ss:$8 sps:$4 sm:$0xff]   ;;  %v148_v34 = vld [vmem:[#allocation3 + $0x28] sm:$0xff] }
  0x41   :  { %875 = vmatpush1.bf16.msra.mxu0 %v2370_v6  ;;  %141 = vst [vmem:[#allocation2 + $0x8] sm:$0xfc] %v129_v16  ;;  %140 = vst [vmem:[#allocation2] sm:$0xfc] %v128_v22  ;;  %v2386_v25 = vld [vmem:[#allocation6 + $0x84] ss:$8 sps:$4 sm:$0xff]   ;;  %v2841_v26 = vsel %vm127_vm0, %v129_v16, %v132_v17 }
  0x42   :  { %876 = vmatprep.subr.bf16.mxu0 %v2371_v7  ;;  %144 = vst [vmem:[#allocation2 + $0x20] sm:$0x3] %v130_v23  ;;  %v2388_v27 = vld [vmem:[#allocation6 + $0x80] ss:$8 sps:$4 sm:$0xff]   ;;  %v2389_v29 = vld [vmem:[#allocation6 + $0x94] ss:$8 sps:$4 sm:$0xff]   ;;  %v2845_v53 = vsel %vm127_vm0, %v128_v22, %v130_v23 }
  0x43   :  { %v2391_v31 = vld [vmem:[#allocation6 + $0x90] ss:$8 sps:$4 sm:$0xff]   ;;  %v2392_v32 = vld [vmem:[#allocation6 + $0xa4] ss:$8 sps:$4 sm:$0xff]   ;;  %v2394_v33 = vld [vmem:[#allocation6 + $0xa0] ss:$8 sps:$4 sm:$0xff]  }
  0x44   :  { %v150_v35 = vld [vmem:[#allocation3 + $0x38] sm:$0xff]  ;;  %v157_v37 = vrot.slane %v148_v34, 4  ;;  %v147_v39 = vld [vmem:[#allocation3 + $0x20] sm:$0xff]  ;;  %v149_v40 = vld [vmem:[#allocation3 + $0x30] sm:$0xff]  ;;  %vm206_vm2 = vsmask.f32 7424 }
  0x45   :  { %877 = vmatpush1.bf16.msra.mxu0 %v2373_v8  ;;  %v2395_v36 = vld [vmem:[#allocation6 + $0xb4] ss:$8 sps:$4 sm:$0xff]   ;;  %v160_v38 = vrot.slane %v150_v35, 4  ;;  %v156_v41 = vrot.slane %v147_v39, 4  ;;  %v158_v42 = vrot.slane %v149_v40, 4  ;;  %vm265_vm3 = vcmask 1046528  }
  0x46   :  { %878 = vmatprep.subr.bf16.mxu0 %v2374_v9  ;;  %169 = vst [vmem:[#allocation2 + $0x28] sm:$0xf0] %v157_v37  ;;  %v2397_v43 = vld [vmem:[#allocation6 + $0xb0] ss:$8 sps:$4 sm:$0xff]   ;;  %v2398_v44 = vld [vmem:[#allocation6 + $0xc4] ss:$8 sps:$4 sm:$0xff]  }
  0x47   :  { %173 = vst [vmem:[#allocation2 + $0x48] sm:$0xf] %v160_v38  ;;  %168 = vst [vmem:[#allocation2 + $0x20] sm:$0xf0] %v156_v41  ;;  %v2400_v45 = vld [vmem:[#allocation6 + $0xc0] ss:$8 sps:$4 sm:$0xff]   ;;  %v2848_v55 = vsel %vm155_vm1, %v157_v37, %v160_v38  ;;  %v2863_v2 = vsel %vm155_vm1, %v156_v41, %v158_v42 }
  0x48   :  { %v185_v28 = vld [vmem:[#allocation2 + $0x8] sm:$0xff]  ;;  %172 = vst [vmem:[#allocation2 + $0x40] sm:$0xf] %v158_v42  ;;  %v2404_v48 = vld [vmem:[#allocation6 + $0xe4] ss:$8 sps:$4 sm:$0xff]   ;;  %v184_v54 = vld [vmem:[#allocation2] sm:$0xff] }
  0x49   :  { %879 = vmatpush1.bf16.msra.mxu0 %v2376_v10  ;;  %v193_v30 = vpack.c.bf16 %v2841_v26, %v185_v28  ;;  %v2401_v46 = vld [vmem:[#allocation6 + $0xd4] ss:$8 sps:$4 sm:$0xff]   ;;  %v2403_v47 = vld [vmem:[#allocation6 + $0xd0] ss:$8 sps:$4 sm:$0xff]   ;;  %v2406_v49 = vld [vmem:[#allocation6 + $0xe0] ss:$8 sps:$4 sm:$0xff]   ;;  %v192_v58 = vpack.c.bf16 %v2845_v53, %v184_v54 }
  0x4a   :  { %880 = vmatprep.subr.bf16.mxu0 %v2377_v11  ;;  %v2407_v50 = vld [vmem:[#allocation6 + $0xf4] ss:$8 sps:$4 sm:$0xff]   ;;  %v2409_v51 = vld [vmem:[#allocation6 + $0xf0] ss:$8 sps:$4 sm:$0xff]   ;;  %v2412_v52 = vld [vmem:[#allocation6 + $0x104] ss:$8 sps:$4 sm:$0xff]  }
  0x4b   :  { %902 = vmatprep.mubr.bf16.mxu0 %v193_v30  ;;  %v2852_v57 = vld [vmem:[#allocation2 + $0x8] sm:$0xfe]  ;;  %v2410_v59 = vld [vmem:[#allocation6 + $0x100] ss:$8 sps:$4 sm:$0xff]   ;;  %v2418_v1 = vld [vmem:[#allocation6 + $0x124] ss:$8 sps:$4 sm:$0xff]  }
  0x4c   :  { %v2415_v61 = vld [vmem:[#allocation6 + $0x114] ss:$8 sps:$4 sm:$0xff]   ;;  %v199_v62 = vpack.c.bf16 %v2841_v26, %v2852_v57  ;;  %v2413_v63 = vld [vmem:[#allocation6 + $0x110] ss:$8 sps:$4 sm:$0xff]   ;;  %v2416_v7 = vld [vmem:[#allocation6 + $0x120] ss:$8 sps:$4 sm:$0xff]  }
  0x4d   :  { %881 = vmatpush1.bf16.msra.mxu0 %v2379_v12  ;;  %v2850_v56 = vld [vmem:[#allocation2 + $0x28] sm:$0xff]  ;;  %v2424_v14 = vld [vmem:[#allocation6 + $0x144] ss:$8 sps:$4 sm:$0xff]   ;;  %v2508_v23 = vld [vmem:[#allocation8] ss:$8 sps:$4 sm:$0xff]   ;;  %vm1083_vm7 = vcmask 1040384  }
  0x4e   :  { %882 = vmatprep.subr.bf16.mxu0 %v2380_v13  ;;  %v2857_v60 = vpack.c.bf16 %v2848_v55, %v2850_v56  ;;  %v2865_v3 = vld [vmem:[#allocation2 + $0x20] sm:$0xff]  ;;  %v187_v4 = vld [vmem:[#allocation2 + $0x48] sm:$0xf]  ;;  %v222_v5 = vshll.u32 %v199_v62, 16  ;;  %v220_v10 = vshrl.u32 %v199_v62, 16  ;;  %vm2052_vm10 = vcmask 1044480  }
  0x4f   :  { %v2869_v6 = vpack.c.bf16 %v2863_v2, %v2865_v3  ;;  %v2421_v8 = vld [vmem:[#allocation6 + $0x134] ss:$8 sps:$4 sm:$0xff]   ;;  %v197_v9 = vpack.c.bf16 %v187_v4, %v187_v4  ;;  %v2419_v13 = vld [vmem:[#allocation6 + $0x130] ss:$8 sps:$4 sm:$0xff]   ;;  %v2506_v22 = vld [vmem:[#allocation8 + $0x4] ss:$8 sps:$4 sm:$0xff]  }
  0x50   :  { %v224_v11 = vrot.slane %v222_v5, 1  ;;  %v227_v12 = vshll.u32 %v2857_v60, 16  ;;  %v186_v15 = vld [vmem:[#allocation2 + $0x40] sm:$0xf]  ;;  %v2427_v19 = vld [vmem:[#allocation6 + $0x154] ss:$8 sps:$4 sm:$0xff]   ;;  %1762 = vmatprep.subr.bf16.mxu1 %v2506_v22 }
  0x51   :  { %883 = vmatpush1.bf16.msra.mxu0 %v2382_v18  ;;  %v2422_v18 = vld [vmem:[#allocation6 + $0x140] ss:$8 sps:$4 sm:$0xff]   ;;  %v196_v20 = vpack.c.bf16 %v186_v15, %v186_v15  ;;  %1763 = vmatpush1.bf16.msra.mxu1 %v2508_v23  ;;  %v2511_v28 = vld [vmem:[#allocation8 + $0x10] ss:$8 sps:$4 sm:$0xff]   ;;  %v2515_v34 = vld [vmem:[#allocation8 + $0x34] ss:$8 sps:$4 sm:$0xff]  }
  0x52   :  { %884 = vmatprep.subr.bf16.mxu0 %v2383_v21  ;;  %v225_v16 = vor.u32 %v224_v11, %v220_v10  ;;  %v2873_v17 = vrot.slane %v227_v12, 1  ;;  %v2428_v30 = vld [vmem:[#allocation6 + $0x160] ss:$8 sps:$4 sm:$0xff]   ;;  %v2436_v35 = vld [vmem:[#allocation6 + $0x184] ss:$8 sps:$4 sm:$0xff]   ;;  %v215_v15 = vshll.u32 %v2869_v6, 16 }
  0x53   :  { %v2518_v37 = vld [vmem:[#allocation8 + $0x44] ss:$8 sps:$4 sm:$0xff]   ;;  %v2434_v38 = vld [vmem:[#allocation6 + $0x180] ss:$8 sps:$4 sm:$0xff]   ;;  %v2439_v39 = vld [vmem:[#allocation6 + $0x194] ss:$8 sps:$4 sm:$0xff]  }
  0x54   :  { %v230_v21 = vsel %vm206_vm2, %v225_v16, %v2873_v17  ;;  %v2520_v40 = vld [vmem:[#allocation8 + $0x40] ss:$8 sps:$4 sm:$0xff]   ;;  %v2521_v41 = vld [vmem:[#allocation8 + $0x54] ss:$8 sps:$4 sm:$0xff]   ;;  %v2437_v42 = vld [vmem:[#allocation6 + $0x190] ss:$8 sps:$4 sm:$0xff]  }
  0x55   :  { %885 = vmatpush1.bf16.msra.mxu0 %v2385_v24  ;;  %v2509_v24 = vld [vmem:[#allocation8 + $0x14] ss:$8 sps:$4 sm:$0xff]   ;;  %v2529_v54 = vld [vmem:[#allocation8 + $0x70] ss:$8 sps:$4 sm:$0xff]   ;;  %v2536_v11 = vld [vmem:[#allocation8 + $0xa4] ss:$8 sps:$4 sm:$0xff]  }
  0x56   :  { %886 = vmatprep.subr.bf16.mxu0 %v2386_v25  ;;  %v2425_v25 = vld [vmem:[#allocation6 + $0x150] ss:$8 sps:$4 sm:$0xff]   ;;  %1764 = vmatprep.subr.bf16.mxu1 %v2509_v24  ;;  %v2451_v62 = vld [vmem:[#allocation6 + $0x1d4] ss:$8 sps:$4 sm:$0xff]   ;;  %v2452_v12 = vld [vmem:[#allocation6 + $0x1e0] ss:$8 sps:$4 sm:$0xff]  }
  0x57   :  { %1765 = vmatpush1.bf16.msra.mxu1 %v2511_v28  ;;  %v2533_v4 = vld [vmem:[#allocation8 + $0x94] ss:$8 sps:$4 sm:$0xff]   ;;  %v2449_v5 = vld [vmem:[#allocation6 + $0x1d0] ss:$8 sps:$4 sm:$0xff]   ;;  %v217_v24 = vrot.slane %v215_v15, 1 }
  0x58   :  { %v2535_v10 = vld [vmem:[#allocation8 + $0x90] ss:$8 sps:$4 sm:$0xff]   ;;  %v2457_v16 = vld [vmem:[#allocation6 + $0x1f4] ss:$8 sps:$4 sm:$0xff]   ;;  %v2496_v15 = vld [vmem:[#allocation6 + $0x2c4] ss:$8 sps:$4 sm:$0xff]  }
  0x59   :  { %887 = vmatpush1.bf16.msra.mxu0 %v2388_v27  ;;  %v2430_v27 = vld [vmem:[#allocation6 + $0x164] ss:$8 sps:$4 sm:$0xff]   ;;  %v2455_v22 = vld [vmem:[#allocation6 + $0x1f0] ss:$8 sps:$4 sm:$0xff]  }
  0x5a   :  { %888 = vmatprep.subr.bf16.mxu0 %v2389_v29  ;;  %v2512_v29 = vld [vmem:[#allocation8 + $0x24] ss:$8 sps:$4 sm:$0xff]  }
  0x5b   :  { %1766 = vmatprep.subr.bf16.mxu1 %v2512_v29 }
  0x5d   :  { %889 = vmatpush1.bf16.msra.mxu0 %v2391_v31  ;;  %v2433_v31 = vld [vmem:[#allocation6 + $0x174] ss:$8 sps:$4 sm:$0xff]  }
  0x5e   :  { %890 = vmatprep.subr.bf16.mxu0 %v2392_v32  ;;  %v2431_v32 = vld [vmem:[#allocation6 + $0x170] ss:$8 sps:$4 sm:$0xff]  }
  0x61   :  { %891 = vmatpush1.bf16.msra.mxu0 %v2394_v33  ;;  %v2514_v33 = vld [vmem:[#allocation8 + $0x20] ss:$8 sps:$4 sm:$0xff]  }
  0x62   :  { %892 = vmatprep.subr.bf16.mxu0 %v2395_v36  ;;  %v2517_v36 = vld [vmem:[#allocation8 + $0x30] ss:$8 sps:$4 sm:$0xff]   ;;  %1767 = vmatpush1.bf16.msra.mxu1 %v2514_v33 }
  0x63   :  { %1768 = vmatprep.subr.bf16.mxu1 %v2515_v34  ;;  %v2463_v34 = vld [vmem:[#allocation6 + $0x214] ss:$8 sps:$4 sm:$0xff]  }
  0x65   :  { %893 = vmatpush1.bf16.msra.mxu0 %v2397_v43  ;;  %v2442_v43 = vld [vmem:[#allocation6 + $0x1a4] ss:$8 sps:$4 sm:$0xff]  }
  0x66   :  { %894 = vmatprep.subr.bf16.mxu0 %v2398_v44  ;;  %1769 = vmatpush1.bf16.msra.mxu1 %v2517_v36  ;;  %v2523_v44 = vld [vmem:[#allocation8 + $0x50] ss:$8 sps:$4 sm:$0xff]  }
  0x67   :  { %1770 = vmatprep.subr.bf16.mxu1 %v2518_v37  ;;  %v2461_v36 = vld [vmem:[#allocation6 + $0x210] ss:$8 sps:$4 sm:$0xff]  }
  0x69   :  { %895 = vmatpush1.bf16.msra.mxu0 %v2400_v45  ;;  %v2524_v45 = vld [vmem:[#allocation8 + $0x64] ss:$8 sps:$4 sm:$0xff]  }
  0x6a   :  { %896 = vmatprep.subr.bf16.mxu0 %v2401_v46  ;;  %v2440_v46 = vld [vmem:[#allocation6 + $0x1a0] ss:$8 sps:$4 sm:$0xff]   ;;  %1771 = vmatpush1.bf16.msra.mxu1 %v2520_v40  ;;  %v189_v40 = vld [vmem:[#allocation2 + $0x8] sm:$0xfc] }
  0x6b   :  { %1772 = vmatprep.subr.bf16.mxu1 %v2521_v41  ;;  %v2464_v41 = vld [vmem:[#allocation6 + $0x220] ss:$8 sps:$4 sm:$0xff]  }
  0x6d   :  { %897 = vmatpush1.bf16.msra.mxu0 %v2403_v47  ;;  %v2445_v47 = vld [vmem:[#allocation6 + $0x1b4] ss:$8 sps:$4 sm:$0xff]  }
  0x6e   :  { %898 = vmatprep.subr.bf16.mxu0 %v2404_v48  ;;  %v2526_v48 = vld [vmem:[#allocation8 + $0x60] ss:$8 sps:$4 sm:$0xff]   ;;  %1773 = vmatpush1.bf16.msra.mxu1 %v2523_v44  ;;  %v2469_v44 = vld [vmem:[#allocation6 + $0x234] ss:$8 sps:$4 sm:$0xff]  }
  0x6f   :  { %1774 = vmatprep.subr.bf16.mxu1 %v2524_v45  ;;  %v203_v45 = vpack.c.bf16 %v2841_v26, %v189_v40  ;;  %v2544_v40 = vld [vmem:[#allocation8 + $0xc0] ss:$8 sps:$4 sm:$0xff]  }
  0x71   :  { %899 = vmatpush1.bf16.msra.mxu0 %v2406_v49  ;;  %v2527_v49 = vld [vmem:[#allocation8 + $0x74] ss:$8 sps:$4 sm:$0xff]  }
  0x72   :  { %900 = vmatprep.subr.bf16.mxu0 %v2407_v50  ;;  %v2443_v50 = vld [vmem:[#allocation6 + $0x1b0] ss:$8 sps:$4 sm:$0xff]   ;;  %1775 = vmatpush1.bf16.msra.mxu1 %v2526_v48  ;;  %v2472_v48 = vld [vmem:[#allocation6 + $0x244] ss:$8 sps:$4 sm:$0xff]  }
  0x73   :  { %1776 = vmatprep.subr.bf16.mxu1 %v2527_v49  ;;  %v269_v49 = vrot.slane %v203_v45, 1  ;;  %v2553_v45 = vld [vmem:[#allocation8 + $0xf0] ss:$8 sps:$4 sm:$0xff]  }
  0x75   :  { %901 = vmatpush1.bf16.msra.mxu0 %v2409_v51  ;;  %v2448_v51 = vld [vmem:[#allocation6 + $0x1c4] ss:$8 sps:$4 sm:$0xff]  }
  0x76   :  { %931 = vmatprep.subr.bf16.mxu0 %v2412_v52  ;;  %v2877_v52 = vld [vmem:[#allocation2] sm:$0xfe]  ;;  %1777 = vmatpush1.bf16.msra.mxu1 %v2529_v54  ;;  %v2470_v54 = vld [vmem:[#allocation6 + $0x240] ss:$8 sps:$4 sm:$0xff]  }
  0x78   :  { %903 = vmatmul.mubr.bf16.vlgmr.msra.gmra.mrb[0].mxu0 %v192_v58  ;;  %v2530_v58 = vld [vmem:[#allocation8 + $0x84] ss:$8 sps:$4 sm:$0xff]  }
  0x79   :  { %932 = vmatpush1.bf16.msra.mxu0 %v2410_v59  ;;  %912 = vmatprep.mubr.bf16.mxu0 %v2857_v60  ;;  %v2446_v59 = vld [vmem:[#allocation6 + $0x1c0] ss:$8 sps:$4 sm:$0xff]  }
  0x7a   :  { %933 = vmatprep.subr.bf16.mxu0 %v2415_v61  ;;  %v198_v61 = vpack.c.bf16 %v2845_v53, %v2877_v52  ;;  %1778 = vmatprep.subr.bf16.mxu1 %v2530_v58  ;;  %v2475_v58 = vld [vmem:[#allocation6 + $0x254] ss:$8 sps:$4 sm:$0xff]  }
  0x7d   :  { %934 = vmatpush1.bf16.msra.mxu0 %v2413_v63  ;;  %v2881_v63 = vld [vmem:[#allocation2 + $0x48] sm:$0x1f] }
  0x7e   :  { %935 = vmatprep.subr.bf16.mxu0 %v2418_v1  ;;  %v2532_v1 = vld [vmem:[#allocation8 + $0x80] ss:$8 sps:$4 sm:$0xff]  }
  0x7f   :  { %1779 = vmatpush1.bf16.msra.mxu1 %v2532_v1  ;;  %v2476_v1 = vld [vmem:[#allocation6 + $0x260] ss:$8 sps:$4 sm:$0xff]  }
  0x80   :  { %913 = vmatmul.mubr.bf16.gmra.mrb[4].mxu0 %v2869_v6  ;;  %1780 = vmatprep.subr.bf16.mxu1 %v2533_v4  ;;  %v2481_v4 = vld [vmem:[#allocation6 + $0x274] ss:$8 sps:$4 sm:$0xff]  }
  0x81   :  { %936 = vmatpush1.bf16.msra.mxu0 %v2416_v7  ;;  %922 = vmatprep.mubr.bf16.mxu0 %v197_v9  ;;  %v210_v7 = vshll.u32 %v198_v61, 16  ;;  %v201_v9 = vpack.c.bf16 %v2881_v63, %v2881_v63 }
  0x82   :  { %937 = vmatprep.subr.bf16.mxu0 %v2421_v8  ;;  %v2454_v8 = vld [vmem:[#allocation6 + $0x1e4] ss:$8 sps:$4 sm:$0xff]  }
  0x83   :  { %1781 = vmatpush1.bf16.msra.mxu1 %v2535_v10  ;;  %v2485_v10 = vld [vmem:[#allocation6 + $0x290] ss:$8 sps:$4 sm:$0xff]  }
  0x84   :  { %1782 = vmatprep.subr.bf16.mxu1 %v2536_v11  ;;  %v2490_v11 = vld [vmem:[#allocation6 + $0x2a4] ss:$8 sps:$4 sm:$0xff]  }
  0x85   :  { %938 = vmatpush1.bf16.msra.mxu0 %v2419_v13  ;;  %v208_v13 = vshrl.u32 %v198_v61, 16  ;;  %v2473_v61 = vld [vmem:[#allocation6 + $0x250] ss:$8 sps:$4 sm:$0xff]  }
  0x86   :  { %939 = vmatprep.subr.bf16.mxu0 %v2424_v14  ;;  %v212_v14 = vrot.slane %v210_v7, 1  ;;  %v2484_v7 = vld [vmem:[#allocation6 + $0x284] ss:$8 sps:$4 sm:$0xff]  }
  0x88   :  { %923 = vmatmul.mubr.bf16.gmra.mrb[8].mxu0 %v196_v20  ;;  %v2887_v20 = vld [vmem:[#allocation2 + $0x40] sm:$0x1f]  ;;  %v213_v23 = vor.u32 %v212_v14, %v208_v13 }
  0x89   :  { %940 = vmatpush1.bf16.msra.mxu0 %v2422_v18  ;;  %963 = vmatprep.mubr.bf16.mxu0 %v230_v21  ;;  %v239_v18 = vshrl.u32 %v2857_v60, 16  ;;  %v2538_v21 = vld [vmem:[#allocation8 + $0xa0] ss:$8 sps:$4 sm:$0xff]   ;;  %v2493_v13 = vld [vmem:[#allocation6 + $0x2b4] ss:$8 sps:$4 sm:$0xff]  }
  0x8a   :  { %941 = vmatprep.subr.bf16.mxu0 %v2427_v19  ;;  %v243_v19 = vshll.u32 %v201_v9, 16  ;;  %1783 = vmatpush1.bf16.msra.mxu1 %v2538_v21  ;;  %v2491_v14 = vld [vmem:[#allocation6 + $0x2b0] ss:$8 sps:$4 sm:$0xff]   ;;  %v2502_v21 = vld [vmem:[#allocation6 + $0x2e4] ss:$8 sps:$4 sm:$0xff]  }
  0x8b   :  { %v241_v28 = vor.u32 %v239_v18, %v2873_v17  ;;  %v250_v17 = vshrl.u32 %v201_v9, 16  ;;  %v2487_v9 = vld [vmem:[#allocation6 + $0x294] ss:$8 sps:$4 sm:$0xff]  }
  0x8c   :  { %v245_v29 = vrot.slane %v243_v19, 1  ;;  %v2499_v18 = vld [vmem:[#allocation6 + $0x2d4] ss:$8 sps:$4 sm:$0xff]   ;;  %v2497_v19 = vld [vmem:[#allocation6 + $0x2d0] ss:$8 sps:$4 sm:$0xff]  }
  0x8d   :  { %942 = vmatpush1.bf16.msra.mxu0 %v2425_v25  ;;  %v200_v25 = vpack.c.bf16 %v2887_v20, %v2887_v20 }
  0x8e   :  { %943 = vmatprep.subr.bf16.mxu0 %v2430_v27  ;;  %v2460_v27 = vld [vmem:[#allocation6 + $0x204] ss:$8 sps:$4 sm:$0xff]  }
  0x8f   :  { %v235_v33 = vshll.u32 %v200_v25, 16 }
  0x91   :  { %944 = vmatpush1.bf16.msra.mxu0 %v2428_v30  ;;  %v2458_v30 = vld [vmem:[#allocation6 + $0x200] ss:$8 sps:$4 sm:$0xff]  }
  0x92   :  { %945 = vmatprep.subr.bf16.mxu0 %v2433_v31  ;;  %v218_v31 = vsel %vm206_vm2, %v213_v23, %v217_v24  ;;  %v191_v23 = vld [vmem:[#allocation2 + $0x48] sm:$0x3f] }
  0x95   :  { %946 = vmatpush1.bf16.msra.mxu0 %v2431_v32  ;;  %v231_v32 = vshrl.u32 %v2869_v6, 16 }
  0x96   :  { %947 = vmatprep.subr.bf16.mxu0 %v2436_v35  ;;  %v246_v35 = vsel %vm206_vm2, %v241_v28, %v245_v29  ;;  %v205_v28 = vpack.c.bf16 %v191_v23, %v191_v23 }
  0x97   :  { %v233_v37 = vor.u32 %v231_v32, %v217_v24  ;;  %v2500_v24 = vld [vmem:[#allocation6 + $0x2e0] ss:$8 sps:$4 sm:$0xff]  }
  0x98   :  { %v274_v32 = vrot.slane %v205_v28, 1 }
  0x99   :  { %948 = vmatpush1.bf16.msra.mxu0 %v2434_v38  ;;  %v237_v38 = vrot.slane %v235_v33, 1  ;;  %v190_v33 = vld [vmem:[#allocation2 + $0x40] sm:$0x3f] }
  0x9a   :  { %949 = vmatprep.subr.bf16.mxu0 %v2439_v39  ;;  %v2466_v39 = vld [vmem:[#allocation6 + $0x224] ss:$8 sps:$4 sm:$0xff]  }
  0x9d   :  { %950 = vmatpush1.bf16.msra.mxu0 %v2437_v42  ;;  %v238_v42 = vsel %vm206_vm2, %v233_v37, %v237_v38 }
  0x9e   :  { %951 = vmatprep.subr.bf16.mxu0 %v2442_v43  ;;  %v252_v43 = vor.u32 %v250_v17, %v245_v29  ;;  %v2503_v29 = vld [vmem:[#allocation6 + $0x2f0] ss:$8 sps:$4 sm:$0xff]  }
  0x9f   :  { %v2541_v17 = vld [vmem:[#allocation8 + $0xb0] ss:$8 sps:$4 sm:$0xff]  }
  0xa1   :  { %952 = vmatpush1.bf16.msra.mxu0 %v2440_v46  ;;  %v247_v46 = vshrl.u32 %v200_v25, 16 }
  0xa2   :  { %953 = vmatprep.subr.bf16.mxu0 %v2445_v47  ;;  %v2467_v47 = vld [vmem:[#allocation6 + $0x230] ss:$8 sps:$4 sm:$0xff]  }
  0xa5   :  { %954 = vmatpush1.bf16.msra.mxu0 %v2443_v50  ;;  %v270_v50 = vrot.slane %v2857_v60, 1  ;;  %v2547_v60 = vld [vmem:[#allocation8 + $0xd0] ss:$8 sps:$4 sm:$0xff]  }
  0xa6   :  { %955 = vmatprep.subr.bf16.mxu0 %v2448_v51  ;;  %v249_v51 = vor.u32 %v247_v46, %v237_v38  ;;  %v2556_v46 = vld [vmem:[#allocation8 + $0x104] ss:$8 sps:$4 sm:$0xff]  }
  0xa9   :  { %956 = vmatpush1.bf16.msra.mxu0 %v2446_v59  ;;  %v271_v59 = vsel %vm265_vm3, %v269_v49, %v270_v50 }
  0xaa   :  { %957 = vmatprep.subr.bf16.mxu0 %v2451_v62  ;;  %v2478_v62 = vld [vmem:[#allocation6 + $0x264] ss:$8 sps:$4 sm:$0xff]  }
  0xad   :  { %958 = vmatpush1.bf16.msra.mxu0 %v2449_v5  ;;  %v2479_v5 = vld [vmem:[#allocation6 + $0x270] ss:$8 sps:$4 sm:$0xff]  }
  0xae   :  { %959 = vmatprep.subr.bf16.mxu0 %v2454_v8  ;;  %v2482_v8 = vld [vmem:[#allocation6 + $0x280] ss:$8 sps:$4 sm:$0xff]  }
  0xb1   :  { %960 = vmatpush1.bf16.msra.mxu0 %v2452_v12  ;;  %v2488_v12 = vld [vmem:[#allocation6 + $0x2a0] ss:$8 sps:$4 sm:$0xff]  }
  0xb2   :  { %961 = vmatprep.subr.bf16.mxu0 %v2457_v16  ;;  %v2494_v16 = vld [vmem:[#allocation6 + $0x2c0] ss:$8 sps:$4 sm:$0xff]  }
  0xb5   :  { %962 = vmatpush1.bf16.msra.mxu0 %v2455_v22  ;;  %v188_v22 = vld [vmem:[#allocation2] sm:$0xfc] }
  0xb6   :  { %992 = vmatprep.subr.bf16.mxu0 %v2460_v27  ;;  %v202_v25 = vpack.c.bf16 %v2845_v53, %v188_v22  ;;  %v2505_v27 = vld [vmem:[#allocation6 + $0x2f4] ss:$8 sps:$4 sm:$0xff]  }
  0xb8   :  { %964 = vmatmul.mubr.bf16.vlgmr.msra.gmra.mrb[0].mxu0 %v218_v31  ;;  %v267_v31 = vrot.slane %v2869_v6, 1  ;;  %v2539_v6 = vld [vmem:[#allocation8 + $0xb4] ss:$8 sps:$4 sm:$0xff]  }
  0xb9   :  { %993 = vmatpush1.bf16.msra.mxu0 %v2458_v30  ;;  %973 = vmatprep.mubr.bf16.mxu0 %v246_v35  ;;  %v266_v30 = vrot.slane %v202_v25, 1  ;;  %v204_v35 = vpack.c.bf16 %v190_v33, %v190_v33 }
  0xba   :  { %994 = vmatprep.subr.bf16.mxu0 %v2463_v34  ;;  %1784 = vmatprep.subr.bf16.mxu1 %v2539_v6 }
  0xbb   :  { %v268_v34 = vsel %vm265_vm3, %v266_v30, %v267_v31  ;;  %v272_v37 = vrot.slane %v204_v35, 1  ;;  %1785 = vmatpush1.bf16.msra.mxu1 %v2541_v17 }
  0xbd   :  { %995 = vmatpush1.bf16.msra.mxu0 %v2461_v36  ;;  %v275_v36 = vsel %vm265_vm3, %v270_v50, %v274_v32  ;;  %v273_v38 = vsel %vm265_vm3, %v267_v31, %v272_v37  ;;  %v378_v50 = vld [vmem:[%s3083_s2] sm:$0x3] }
  0xbe   :  { %996 = vmatprep.subr.bf16.mxu0 %v2466_v39  ;;  %v2542_v39 = vld [vmem:[#allocation8 + $0xc4] ss:$8 sps:$4 sm:$0xff]  }
  0xbf   :  { %1786 = vmatprep.subr.bf16.mxu1 %v2542_v39 }
  0xc0   :  { %974 = vmatmul.mubr.bf16.gmra.mrb[4].mxu0 %v238_v42  ;;  %1787 = vmatpush1.bf16.msra.mxu1 %v2544_v40  ;;  %v2548_v42 = vld [vmem:[#allocation8 + $0xe4] ss:$8 sps:$4 sm:$0xff]  }
  0xc1   :  { %997 = vmatpush1.bf16.msra.mxu0 %v2464_v41  ;;  %983 = vmatprep.mubr.bf16.mxu0 %v252_v43  ;;  %v2545_v41 = vld [vmem:[#allocation8 + $0xd4] ss:$8 sps:$4 sm:$0xff]   ;;  %v2550_v43 = vld [vmem:[#allocation8 + $0xe0] ss:$8 sps:$4 sm:$0xff]  }
  0xc2   :  { %998 = vmatprep.subr.bf16.mxu0 %v2469_v44  ;;  %1788 = vmatprep.subr.bf16.mxu1 %v2545_v41  ;;  %v2551_v44 = vld [vmem:[#allocation8 + $0xf4] ss:$8 sps:$4 sm:$0xff]  }
  0xc4   :  { %1789 = vmatpush1.bf16.msra.mxu1 %v2547_v60 }
  0xc5   :  { %999 = vmatpush1.bf16.msra.mxu0 %v2467_v47  ;;  %1790 = vmatprep.subr.bf16.mxu1 %v2548_v42  ;;  %v62_v47 = vlaneseq }
  0xc6   :  { %1000 = vmatprep.subr.bf16.mxu0 %v2472_v48 }
  0xc7   :  { %v2908_v48 = vshrl.u32 %v62_v47, 7 }
  0xc8   :  { %984 = vmatmul.mubr.bf16.gmra.mrb[8].mxu0 %v249_v51  ;;  %1791 = vmatpush1.bf16.msra.mxu1 %v2550_v43 }
  0xc9   :  { %1001 = vmatpush1.bf16.msra.mxu0 %v2470_v54  ;;  %1024 = vmatprep.mubr.bf16.mxu0 %v271_v59  ;;  %v382_v49 = vsub.s32 0, %v2908_v48  ;;  %v386_v51 = vsub.s32 1, %v2908_v48  ;;  %vm68_vm4 = vcmp.ge.s32.totalorder %v2908_v48, 1 }
  0xca   :  { %1002 = vmatprep.subr.bf16.mxu0 %v2475_v58  ;;  %1792 = vmatprep.subr.bf16.mxu1 %v2551_v44 }
  0xcb   :  { %v2917_v54 = vrot.slane %v378_v50, %v382_v49  ;;  %v2921_v58 = vrot.slane %v378_v50, %v386_v51 }
  0xcc   :  { %1793 = vmatpush1.bf16.msra.mxu1 %v2553_v45 }
  0xcd   :  { %1003 = vmatpush1.bf16.msra.mxu0 %v2473_v61  ;;  %1823 = vmatprep.subr.bf16.mxu1 %v2556_v46  ;;  %v65_v61 = vadd.s32 16, %v2908_v48 }
  0xce   :  { %1004 = vmatprep.subr.bf16.mxu0 %v2478_v62 }
  0xcf   :  { %vm75_vm5 = vcmp.le.s32.totalorder %v65_v61, 16  ;;  %vm85_vm6 = vcmp.ge.s32.totalorder %v65_v61, 19 }
  0xd0   :  { %vm100_vm8 = vmor %vm75_vm5, %vm85_vm6 }
  0xd1   :  { %1005 = vmatpush1.bf16.msra.mxu0 %v2476_v1 }
  0xd2   :  { %1006 = vmatprep.subr.bf16.mxu0 %v2481_v4  ;;  %v2927_v4 = vsel %vm68_vm4, 1.0, %v2751_v0 }
  0xd5   :  { %1007 = vmatpush1.bf16.msra.mxu0 %v2479_v5 }
  0xd6   :  { %1008 = vmatprep.subr.bf16.mxu0 %v2484_v7 }
  0xd9   :  { %1009 = vmatpush1.bf16.msra.mxu0 %v2482_v8 }
  0xda   :  { %1010 = vmatprep.subr.bf16.mxu0 %v2487_v9 }
  0xdd   :  { %1011 = vmatpush1.bf16.msra.mxu0 %v2485_v10 }
  0xde   :  { %1012 = vmatprep.subr.bf16.mxu0 %v2490_v11 }
  0xe1   :  { %1013 = vmatpush1.bf16.msra.mxu0 %v2488_v12 }
  0xe2   :  { %1014 = vmatprep.subr.bf16.mxu0 %v2493_v13 }
  0xe5   :  { %1015 = vmatpush1.bf16.msra.mxu0 %v2491_v14 }
  0xe6   :  { %1016 = vmatprep.subr.bf16.mxu0 %v2496_v15 }
  0xe9   :  { %1017 = vmatpush1.bf16.msra.mxu0 %v2494_v16 }
  0xea   :  { %1018 = vmatprep.subr.bf16.mxu0 %v2499_v18 }
  0xed   :  { %1019 = vmatpush1.bf16.msra.mxu0 %v2497_v19 }
  0xee   :  { %1020 = vmatprep.subr.bf16.mxu0 %v2502_v21 }
  0xf1   :  { %1021 = vmatpush1.bf16.msra.mxu0 %v2500_v24 }
  0xf2   :  { %1022 = vmatprep.subr.bf16.mxu0 %v2505_v27  ;;  %v67_v27 = vadd.s32 32, %v2908_v48 }
  0xf4   :  { %vm92_vm9 = vcmp.le.s32.totalorder %v67_v27, 34 }
  0xf5   :  { %1023 = vmatpush1.bf16.msra.mxu0 %v2503_v29  ;;  %v2953_v44 = vsel %vm92_vm9, 1.0, %v2751_v0 }
  0xf8   :  { %1025 = vmatmul.mubr.bf16.vlgmr.msra.gmra.mrb[0].mxu0 %v268_v34 }
  0xf9   :  { %1034 = vmatprep.mubr.bf16.mxu0 %v275_v36 }
 0x100   :  { %1035 = vmatmul.mubr.bf16.gmra.mrb[4].mxu0 %v273_v38 }
 0x101   :  { %1044 = vmatprep.mubr.bf16.mxu0 %v274_v32  ;;  %v2943_v32 = vsel %vm100_vm8, 1.0, %v2751_v0 }
 0x108   :  { %1045 = vmatmul.mubr.bf16.gmra.mrb[8].mxu0 %v272_v37 }
 0x1cb   :  { %v1026_v59 = vpop.f32.mrb[0].mxu0 }
 0x1cc   :  { %v2285_v62 = vadd.f32 %v1026_v59, %v2917_v54  ;;  %v1028_v1 = vpop.f32.mrb[1].mxu0 }
 0x1cd   :  { %v2286_v5 = vadd.f32 %v1028_v1, %v2921_v58  ;;  %v1030_v7 = vpop.f32.mrb[2].mxu0 }
 0x1ce   :  { %v1053_v8 = vmax.f32 %v2285_v62, 0.0  ;;  %v2287_v9 = vadd.f32 %v1030_v7, %v2917_v54  ;;  %v1032_v10 = vpop.f32.mrb[3].mxu0 }
 0x1cf   :  { %v1054_v11 = vmax.f32 %v2286_v5, 0.0  ;;  %v2288_v12 = vadd.f32 %v1032_v10, %v2921_v58 }
 0x1d0   :  { %v1063_v13 = vmul.f32 %v2927_v4, %v1053_v8  ;;  %v1055_v14 = vmax.f32 %v2287_v9, 0.0 }
 0x1d1   :  { %v1064_v15 = vmul.f32 %v2927_v4, %v1054_v11  ;;  %v1056_v16 = vmax.f32 %v2288_v12, 0.0 }
 0x1d2   :  { %v1084_v18 = vrot.slane %v1063_v13, 7  ;;  %v1086_v19 = vrot.slane %v1055_v14, 7  ;;  %v2934_v21 = vpack.c.bf16 %v1055_v14, %v1063_v13 }
 0x1d3   :  { %v1085_v22 = vrot.slane %v1064_v15, 7  ;;  %v1088_v23 = vrot.slane %v1056_v16, 7  ;;  %v2936_v24 = vpack.c.bf16 %v1056_v16, %v1064_v15  ;;  %v1036_v25 = vpop.f32.mrb[4].mxu0  ;;  %v2554_v15 = vld [vmem:[#allocation8 + $0x100] ss:$8 sps:$4 sm:$0xff]  }
 0x1d4   :  { %1112 = vst [vmem:[#allocation2] sm:$0xfe] %v1084_v18  ;;  %v1087_v28 = vsel %vm1083_vm7, %v1084_v18, %v1086_v19  ;;  %v2289_v29 = vadd.f32 %v1036_v25, %v2917_v54  ;;  %v1038_v30 = vpop.f32.mrb[5].mxu0 }
 0x1d5   :  { %1113 = vst [vmem:[#allocation2 + $0x8] sm:$0xfe] %v1085_v22  ;;  %v1089_v31 = vsel %vm1083_vm7, %v1085_v22, %v1088_v23  ;;  %v2290_v33 = vadd.f32 %v1038_v30, %v2921_v58  ;;  %v1040_v34 = vpop.f32.mrb[6].mxu0 }
 0x1d6   :  { %v1057_v35 = vmax.f32 %v2289_v29, 0.0  ;;  %v2291_v36 = vadd.f32 %v1040_v34, %v2917_v54  ;;  %v1042_v37 = vpop.f32.mrb[7].mxu0 }
 0x1d7   :  { %v1058_v38 = vmax.f32 %v2290_v33, 0.0  ;;  %v2292_v6 = vadd.f32 %v1042_v37, %v2921_v58 }
 0x1d8   :  { %v1067_v17 = vmul.f32 %v2943_v32, %v1057_v35  ;;  %v1059_v39 = vmax.f32 %v2291_v36, 0.0  ;;  %v2562_v36 = vld [vmem:[#allocation8 + $0x124] ss:$8 sps:$4 sm:$0xff]  }
 0x1d9   :  { %v1068_v40 = vmul.f32 %v2943_v32, %v1058_v38  ;;  %v1060_v41 = vmax.f32 %v2292_v6, 0.0 }
 0x1da   :  { %v1090_v60 = vrot.slane %v1067_v17, 7  ;;  %v1094_v42 = vrot.slane %v1059_v39, 7  ;;  %v2950_v43 = vpack.c.bf16 %v1059_v39, %v1067_v17 }
 0x1db   :  { %v1092_v45 = vrot.slane %v1068_v40, 7  ;;  %v1096_v46 = vrot.slane %v1060_v41, 7  ;;  %v2955_v47 = vpack.c.bf16 %v1060_v41, %v1068_v40  ;;  %v1046_v50 = vpop.f32.mrb[8].mxu0  ;;  %v1122_v59 = vld [vmem:[#allocation2] sm:$0xff]  ;;  %v2560_v40 = vld [vmem:[#allocation8 + $0x120] ss:$8 sps:$4 sm:$0xff]  }
 0x1dc   :  { %v1132_v61 = vld [vmem:[#allocation2] sm:$0xfc]  ;;  %v1091_v62 = vsel %vm1083_vm7, %v1086_v19, %v1090_v60  ;;  %v1095_v1 = vsel %vm1083_vm7, %v1090_v60, %v1094_v42  ;;  %v2293_v5 = vadd.f32 %v1046_v50, %v2917_v54  ;;  %v1048_v7 = vpop.f32.mrb[9].mxu0  ;;  %v1123_v8 = vld [vmem:[#allocation2 + $0x8] sm:$0xff]  ;;  %v1136_v10 = vpack.c.bf16 %v1087_v28, %v1122_v59 }
 0x1dd   :  { %v1133_v9 = vld [vmem:[#allocation2 + $0x8] sm:$0xfc]  ;;  %1116 = vst [vmem:[#allocation2 + $0x20] sm:$0xff] %v1091_v62  ;;  %v1093_v0 = vsel %vm1083_vm7, %v1088_v23, %v1092_v45  ;;  %v1097_v11 = vsel %vm1083_vm7, %v1092_v45, %v1096_v46  ;;  %v2294_v12 = vadd.f32 %v1048_v7, %v2921_v58  ;;  %v1050_v13 = vpop.f32.mrb[10].mxu0  ;;  %v1137_v14 = vpack.c.bf16 %v1089_v31, %v1123_v8  ;;  %v2568_v45 = vld [vmem:[#allocation8 + $0x144] ss:$8 sps:$4 sm:$0xff]  }
 0x1de   :  { %1117 = vst [vmem:[#allocation2 + $0x28] sm:$0xff] %v1093_v0  ;;  %v1061_v16 = vmax.f32 %v2293_v5, 0.0  ;;  %v1051_v18 = vpop.f32.mrb[11].mxu0  ;;  %v1149_v19 = vpack.c.bf16 %v1089_v31, %v1133_v9  ;;  %v1148_v22 = vpack.c.bf16 %v1087_v28, %v1132_v61  ;;  %v2559_v54 = vld [vmem:[#allocation8 + $0x114] ss:$8 sps:$4 sm:$0xff]   ;;  %v2963_v25 = vpack.c.bf16 %v1097_v11, %v1093_v0 }
 0x1df   :  { %v1062_v27 = vmax.f32 %v2294_v12, 0.0  ;;  %1794 = vmatprep.mubr.bf16.mxu1 %v1137_v14  ;;  %v2965_v29 = vpack.c.bf16 %v1095_v1, %v1091_v62  ;;  %v2557_v28 = vld [vmem:[#allocation8 + $0x110] ss:$8 sps:$4 sm:$0xff]   ;;  %v2565_v41 = vld [vmem:[#allocation8 + $0x134] ss:$8 sps:$4 sm:$0xff]  }
 0x1e0   :  { %v2968_v23 = vmul.f32 %v2953_v44, %v1061_v16  ;;  %v1161_v30 = vrot.slane %v1149_v19, 1  ;;  %v1158_v58 = vrot.slane %v1148_v22, 1  ;;  %1795 = vmatmul.mubr.bf16.vlgmr.msra.gmra.mrb[0].mxu1 %v1136_v10  ;;  %v1162_v33 = vrot.slane %v2963_v25, 1  ;;  %v2563_v60 = vld [vmem:[#allocation8 + $0x130] ss:$8 sps:$4 sm:$0xff]  }
 0x1e1   :  { %v2972_v34 = vmul.f32 %v2953_v44, %v1062_v27  ;;  %1824 = vmatpush1.bf16.msra.mxu1 %v2554_v15  ;;  %1804 = vmatprep.mubr.bf16.mxu1 %v2963_v25  ;;  %v1159_v31 = vrot.slane %v2965_v29, 1  ;;  %v2566_v62 = vld [vmem:[#allocation8 + $0x140] ss:$8 sps:$4 sm:$0xff]   ;;  %v2571_v1 = vld [vmem:[#allocation8 + $0x154] ss:$8 sps:$4 sm:$0xff]   ;;  %v1966_v25 = vrot.slane %v2877_v52, 1 }
 0x1e2   :  { %v1098_v35 = vrot.slane %v2968_v23, 7  ;;  %1825 = vmatprep.subr.bf16.mxu1 %v2559_v54  ;;  %v2980_v37 = vsel %vm265_vm3, %v1161_v30, %v1162_v33  ;;  %v2574_v5 = vld [vmem:[#allocation8 + $0x164] ss:$8 sps:$4 sm:$0xff]   ;;  %v2572_v7 = vld [vmem:[#allocation8 + $0x160] ss:$8 sps:$4 sm:$0xff]  }
 0x1e3   :  { %v1100_v38 = vrot.slane %v2972_v34, 7  ;;  %v2986_v6 = vsel %vm265_vm3, %v1158_v58, %v1159_v31  ;;  %v2577_v8 = vld [vmem:[#allocation8 + $0x174] ss:$8 sps:$4 sm:$0xff]   ;;  %v2575_v9 = vld [vmem:[#allocation8 + $0x170] ss:$8 sps:$4 sm:$0xff]  }
 0x1e4   :  { %v1099_v17 = vsel %vm1083_vm7, %v1094_v42, %v1098_v35  ;;  %v2580_v10 = vld [vmem:[#allocation8 + $0x184] ss:$8 sps:$4 sm:$0xff]   ;;  %v2578_v0 = vld [vmem:[#allocation8 + $0x180] ss:$8 sps:$4 sm:$0xff]   ;;  %v2583_v11 = vld [vmem:[#allocation8 + $0x194] ss:$8 sps:$4 sm:$0xff]  }
 0x1e5   :  { %1120 = vst [vmem:[#allocation2 + $0x40] sm:$0x1f] %v1099_v17  ;;  %v1101_v39 = vsel %vm1083_vm7, %v1096_v46, %v1100_v38  ;;  %1826 = vmatpush1.bf16.msra.mxu1 %v2557_v28  ;;  %v2569_v46 = vld [vmem:[#allocation8 + $0x150] ss:$8 sps:$4 sm:$0xff]   ;;  %v2586_v13 = vld [vmem:[#allocation8 + $0x1a4] ss:$8 sps:$4 sm:$0xff]  }
 0x1e6   :  { %1121 = vst [vmem:[#allocation2 + $0x48] sm:$0x1f] %v1101_v39  ;;  %1827 = vmatprep.subr.bf16.mxu1 %v2562_v36  ;;  %v2581_v12 = vld [vmem:[#allocation8 + $0x190] ss:$8 sps:$4 sm:$0xff]   ;;  %v2589_v14 = vld [vmem:[#allocation8 + $0x1b4] ss:$8 sps:$4 sm:$0xff]  }
 0x1e7   :  { %v2587_v15 = vld [vmem:[#allocation8 + $0x1b0] ss:$8 sps:$4 sm:$0xff]   ;;  %v2592_v16 = vld [vmem:[#allocation8 + $0x1c4] ss:$8 sps:$4 sm:$0xff]   ;;  %v2590_v18 = vld [vmem:[#allocation8 + $0x1c0] ss:$8 sps:$4 sm:$0xff]  }
 0x1e8   :  { %1805 = vmatmul.mubr.bf16.gmra.mrb[4].mxu1 %v2965_v29  ;;  %v2595_v19 = vld [vmem:[#allocation8 + $0x1d4] ss:$8 sps:$4 sm:$0xff]   ;;  %v2593_v22 = vld [vmem:[#allocation8 + $0x1d0] ss:$8 sps:$4 sm:$0xff]   ;;  %v2598_v54 = vld [vmem:[#allocation8 + $0x1e4] ss:$8 sps:$4 sm:$0xff]  }
 0x1e9   :  { %1828 = vmatpush1.bf16.msra.mxu1 %v2560_v40  ;;  %v2596_v27 = vld [vmem:[#allocation8 + $0x1e0] ss:$8 sps:$4 sm:$0xff]   ;;  %v2601_v30 = vld [vmem:[#allocation8 + $0x1f4] ss:$8 sps:$4 sm:$0xff]   ;;  %v2599_v58 = vld [vmem:[#allocation8 + $0x1f0] ss:$8 sps:$4 sm:$0xff]  }
 0x1ea   :  { %1829 = vmatprep.subr.bf16.mxu1 %v2565_v41  ;;  %v2604_v28 = vld [vmem:[#allocation8 + $0x204] ss:$8 sps:$4 sm:$0xff]   ;;  %v2602_v35 = vld [vmem:[#allocation8 + $0x200] ss:$8 sps:$4 sm:$0xff]   ;;  %v2607_v36 = vld [vmem:[#allocation8 + $0x214] ss:$8 sps:$4 sm:$0xff]   ;;  %v1147_v41 = vpack.c.bf16 %v2972_v34, %v2972_v34 }
 0x1eb   :  { %v2605_v38 = vld [vmem:[#allocation8 + $0x210] ss:$8 sps:$4 sm:$0xff]   ;;  %v2610_v17 = vld [vmem:[#allocation8 + $0x224] ss:$8 sps:$4 sm:$0xff]   ;;  %v2608_v39 = vld [vmem:[#allocation8 + $0x220] ss:$8 sps:$4 sm:$0xff]  }
 0x1ec   :  { %v1130_v50 = vld [vmem:[#allocation2 + $0x40] sm:$0xf]  ;;  %v2613_v40 = vld [vmem:[#allocation8 + $0x234] ss:$8 sps:$4 sm:$0xff]   ;;  %v2622_v34 = vld [vmem:[#allocation8 + $0x264] ss:$8 sps:$4 sm:$0xff]  }
 0x1ed   :  { %1830 = vmatpush1.bf16.msra.mxu1 %v2563_v60  ;;  %v1131_v59 = vld [vmem:[#allocation2 + $0x48] sm:$0xf]  ;;  %v1140_v42 = vpack.c.bf16 %v1130_v50, %v1130_v50  ;;  %v2619_v50 = vld [vmem:[#allocation8 + $0x254] ss:$8 sps:$4 sm:$0xff]  }
 0x1ee   :  { %v1141_v61 = vpack.c.bf16 %v1131_v59, %v1131_v59  ;;  %1831 = vmatprep.subr.bf16.mxu1 %v2568_v45  ;;  %v2611_v60 = vld [vmem:[#allocation8 + $0x230] ss:$8 sps:$4 sm:$0xff]   ;;  %v1146_v45 = vpack.c.bf16 %v2968_v23, %v2968_v23  ;;  %v2631_v23 = vld [vmem:[#allocation8 + $0x294] ss:$8 sps:$4 sm:$0xff]  }
 0x1ef   :  { %v2617_v59 = vld [vmem:[#allocation8 + $0x250] ss:$8 sps:$4 sm:$0xff]  }
 0x1f0   :  { %1814 = vmatprep.mubr.bf16.mxu1 %v1141_v61  ;;  %v2625_v61 = vld [vmem:[#allocation8 + $0x274] ss:$8 sps:$4 sm:$0xff]  }
 0x1f1   :  { %1815 = vmatmul.mubr.bf16.gmra.mrb[8].mxu1 %v1140_v42  ;;  %v2628_v42 = vld [vmem:[#allocation8 + $0x284] ss:$8 sps:$4 sm:$0xff]  }
 0x1f2   :  { %1832 = vmatpush1.bf16.msra.mxu1 %v2566_v62  ;;  %1855 = vmatprep.mubr.bf16.mxu1 %v2936_v24  ;;  %v2584_v24 = vld [vmem:[#allocation8 + $0x1a0] ss:$8 sps:$4 sm:$0xff]   ;;  %v2623_v62 = vld [vmem:[#allocation8 + $0x270] ss:$8 sps:$4 sm:$0xff]  }
 0x1f3   :  { %1833 = vmatprep.subr.bf16.mxu1 %v2571_v1  ;;  %v2626_v1 = vld [vmem:[#allocation8 + $0x280] ss:$8 sps:$4 sm:$0xff]  }
 0x1f6   :  { %1834 = vmatpush1.bf16.msra.mxu1 %v2569_v46  ;;  %v2629_v46 = vld [vmem:[#allocation8 + $0x290] ss:$8 sps:$4 sm:$0xff]  }
 0x1f7   :  { %1835 = vmatprep.subr.bf16.mxu1 %v2574_v5  ;;  %v2634_v5 = vld [vmem:[#allocation8 + $0x2a4] ss:$8 sps:$4 sm:$0xff]  }
 0x1fa   :  { %1836 = vmatpush1.bf16.msra.mxu1 %v2572_v7  ;;  %v2637_v7 = vld [vmem:[#allocation8 + $0x2b4] ss:$8 sps:$4 sm:$0xff]  }
 0x1fb   :  { %1837 = vmatprep.subr.bf16.mxu1 %v2577_v8  ;;  %v2635_v8 = vld [vmem:[#allocation8 + $0x2b0] ss:$8 sps:$4 sm:$0xff]  }
 0x1fe   :  { %1838 = vmatpush1.bf16.msra.mxu1 %v2575_v9  ;;  %v2640_v9 = vld [vmem:[#allocation8 + $0x2c4] ss:$8 sps:$4 sm:$0xff]  }
 0x1ff   :  { %1839 = vmatprep.subr.bf16.mxu1 %v2580_v10  ;;  %v2638_v10 = vld [vmem:[#allocation8 + $0x2c0] ss:$8 sps:$4 sm:$0xff]  }
 0x202   :  { %1840 = vmatpush1.bf16.msra.mxu1 %v2578_v0  ;;  %v2643_v0 = vld [vmem:[#allocation8 + $0x2d4] ss:$8 sps:$4 sm:$0xff]  }
 0x203   :  { %1841 = vmatprep.subr.bf16.mxu1 %v2583_v11  ;;  %v2641_v11 = vld [vmem:[#allocation8 + $0x2d0] ss:$8 sps:$4 sm:$0xff]  }
 0x206   :  { %1842 = vmatpush1.bf16.msra.mxu1 %v2581_v12  ;;  %v2646_v12 = vld [vmem:[#allocation8 + $0x2e4] ss:$8 sps:$4 sm:$0xff]  }
 0x207   :  { %1843 = vmatprep.subr.bf16.mxu1 %v2586_v13  ;;  %v2644_v13 = vld [vmem:[#allocation8 + $0x2e0] ss:$8 sps:$4 sm:$0xff]  }
 0x20a   :  { %1844 = vmatpush1.bf16.msra.mxu1 %v2584_v24  ;;  %v1135_v24 = vld [vmem:[#allocation2 + $0x48] sm:$0x3f] }
 0x20b   :  { %1845 = vmatprep.subr.bf16.mxu1 %v2589_v14  ;;  %v2649_v14 = vld [vmem:[#allocation8 + $0x2f4] ss:$8 sps:$4 sm:$0xff]  }
 0x20e   :  { %1846 = vmatpush1.bf16.msra.mxu1 %v2587_v15  ;;  %v1151_v15 = vpack.c.bf16 %v1135_v24, %v1135_v24 }
 0x20f   :  { %1847 = vmatprep.subr.bf16.mxu1 %v2592_v16  ;;  %v2647_v16 = vld [vmem:[#allocation8 + $0x2f0] ss:$8 sps:$4 sm:$0xff]  }
 0x212   :  { %1848 = vmatpush1.bf16.msra.mxu1 %v2590_v18  ;;  %v1166_v18 = vrot.slane %v1151_v15, 1 }
 0x213   :  { %1849 = vmatprep.subr.bf16.mxu1 %v2595_v19  ;;  %v1134_v19 = vld [vmem:[#allocation2 + $0x40] sm:$0x3f] }
 0x216   :  { %1850 = vmatpush1.bf16.msra.mxu1 %v2593_v22  ;;  %v1150_v22 = vpack.c.bf16 %v1134_v19, %v1134_v19 }
 0x217   :  { %1851 = vmatprep.subr.bf16.mxu1 %v2598_v54  ;;  %v1167_v54 = vsel %vm265_vm3, %v1162_v33, %v1166_v18  ;;  %v1967_v33 = vrot.slane %v2845_v53, 1 }
 0x219   :  { %v1968_v52 = vsel %vm265_vm3, %v1966_v25, %v1967_v33 }
 0x21a   :  { %1852 = vmatpush1.bf16.msra.mxu1 %v2596_v27  ;;  %v1164_v27 = vrot.slane %v1150_v22, 1 }
 0x21b   :  { %1853 = vmatprep.subr.bf16.mxu1 %v2601_v30 }
 0x21c   :  { %v1165_v30 = vsel %vm265_vm3, %v1159_v31, %v1164_v27  ;;  %v1972_v31 = vrot.slane %v2865_v3, 1 }
 0x21e   :  { %1854 = vmatpush1.bf16.msra.mxu1 %v2599_v58  ;;  %v1270_v58 = vld [vmem:[%s3085_s4] sm:$0x3]  ;;  %v1973_v48 = vsel %vm265_vm3, %v1967_v33, %v1972_v31  ;;  %s2752_s4 = smov [#allocation9]  }
 0x21f   :  { %1884 = vmatprep.subr.bf16.mxu1 %v2604_v28  ;;  %v3018_v29 = vrot.slane %v1270_v58, %v386_v51  ;;  %v1969_v28 = vrot.slane %v2852_v57, 1  ;;  %s2077_s8 = sshll.u32 %s2752_s4, 4  ;;  %s2078_s8 = int_to_ptr.vmem [resolvable:$true] %s2077_s8 }
 0x220   :  { %s2716_s9 = scalar_lea.vmem %s2078_s8, 1024  ;;  %p2721_p11 = scmp.lt.s32.totalorder %s2078_s8, %s2078_s8 }
 0x221   :  { %1856 = vmatmul.mubr.bf16.vlgmr.msra.gmra.mrb[0].mxu1 %v2934_v21  ;;  %v2616_v21 = vld [vmem:[#allocation8 + $0x244] ss:$8 sps:$4 sm:$0xff]   ;;  %p2717_p10 = scmp.ne.s32.totalorder %s2078_s8, %s2716_s9  ;;  %p2722_p12 = scmp.lt.s32.totalorder %s2716_s9, %s2716_s9 }
 0x222   :  { %1865 = vmatprep.mubr.bf16.mxu1 %v2955_v47  ;;  %1885 = vmatpush1.bf16.msra.mxu1 %v2602_v35  ;;  %v2614_v47 = vld [vmem:[#allocation8 + $0x240] ss:$8 sps:$4 sm:$0xff]   ;;  %v1970_v35 = vrot.slane %v2841_v26, 1 }
 0x223   :  { %1886 = vmatprep.subr.bf16.mxu1 %v2607_v36  ;;  %v1974_v36 = vrot.slane %v2850_v56, 1  ;;  %p2723_p13 = por %p2722_p12, %p2721_p11 }
 0x224   :  { %v1971_v3 = vsel %vm265_vm3, %v1969_v28, %v1970_v35 }
 0x225   :  { %v1975_v56 = vsel %vm265_vm3, %v1970_v35, %v1974_v36  ;;  %p2724_p0 = pnand %p2723_p13, %p2717_p10 }
 0x226   :  { %1887 = vmatpush1.bf16.msra.mxu1 %v2605_v38 }
 0x227   :  { %1888 = vmatprep.subr.bf16.mxu1 %v2610_v17 }
 0x229   :  { %1866 = vmatmul.mubr.bf16.gmra.mrb[4].mxu1 %v2950_v43  ;;  %v2620_v43 = vld [vmem:[#allocation8 + $0x260] ss:$8 sps:$4 sm:$0xff]  }
 0x22a   :  { %1875 = vmatprep.mubr.bf16.mxu1 %v1147_v41  ;;  %1889 = vmatpush1.bf16.msra.mxu1 %v2608_v39 }
 0x22b   :  { %1890 = vmatprep.subr.bf16.mxu1 %v2613_v40 }
 0x22e   :  { %1891 = vmatpush1.bf16.msra.mxu1 %v2611_v60 }
 0x22f   :  { %1892 = vmatprep.subr.bf16.mxu1 %v2616_v21 }
 0x231   :  { %1876 = vmatmul.mubr.bf16.gmra.mrb[8].mxu1 %v1146_v45  ;;  %v1980_v45 = vrot.slane %v2887_v20, 1 }
 0x232   :  { %1893 = vmatpush1.bf16.msra.mxu1 %v2614_v47  ;;  %1916 = vmatprep.mubr.bf16.mxu1 %v2980_v37  ;;  %v2632_v37 = vld [vmem:[#allocation8 + $0x2a0] ss:$8 sps:$4 sm:$0xff]   ;;  %v1976_v47 = vrot.slane %v2863_v2, 1 }
 0x233   :  { %1894 = vmatprep.subr.bf16.mxu1 %v2619_v50 }
 0x234   :  { %v1981_v20 = vsel %vm265_vm3, %v1976_v47, %v1980_v45 }
 0x236   :  { %1895 = vmatpush1.bf16.msra.mxu1 %v2617_v59 }
 0x237   :  { %1896 = vmatprep.subr.bf16.mxu1 %v2622_v34  ;;  %v1978_v34 = vrot.slane %v2848_v55, 1 }
 0x23a   :  { %1897 = vmatpush1.bf16.msra.mxu1 %v2620_v43  ;;  %v1982_v43 = vrot.slane %v2881_v63, 1  ;;  %v1979_v63 = vsel %vm265_vm3, %v1974_v36, %v1978_v34 }
 0x23b   :  { %1898 = vmatprep.subr.bf16.mxu1 %v2625_v61 }
 0x23e   :  { %1899 = vmatpush1.bf16.msra.mxu1 %v2623_v62 }
 0x23f   :  { %1900 = vmatprep.subr.bf16.mxu1 %v2628_v42 }
 0x242   :  { %1901 = vmatpush1.bf16.msra.mxu1 %v2626_v1 }
 0x243   :  { %1902 = vmatprep.subr.bf16.mxu1 %v2631_v23 }
 0x246   :  { %1903 = vmatpush1.bf16.msra.mxu1 %v2629_v46 }
 0x247   :  { %1904 = vmatprep.subr.bf16.mxu1 %v2634_v5 }
 0x24a   :  { %1905 = vmatpush1.bf16.msra.mxu1 %v2632_v37  ;;  %v1977_v37 = vsel %vm265_vm3, %v1972_v31, %v1976_v47 }
 0x24b   :  { %1906 = vmatprep.subr.bf16.mxu1 %v2637_v7 }
 0x24e   :  { %1907 = vmatpush1.bf16.msra.mxu1 %v2635_v8 }
 0x24f   :  { %1908 = vmatprep.subr.bf16.mxu1 %v2640_v9  ;;  %v1983_v9 = vsel %vm265_vm3, %v1978_v34, %v1982_v43 }
 0x252   :  { %1909 = vmatpush1.bf16.msra.mxu1 %v2638_v10 }
 0x253   :  { %1910 = vmatprep.subr.bf16.mxu1 %v2643_v0 }
 0x256   :  { %1911 = vmatpush1.bf16.msra.mxu1 %v2641_v11 }
 0x257   :  { %1912 = vmatprep.subr.bf16.mxu1 %v2646_v12 }
 0x25a   :  { %1913 = vmatpush1.bf16.msra.mxu1 %v2644_v13 }
 0x25b   :  { %1914 = vmatprep.subr.bf16.mxu1 %v2649_v14 }
 0x25e   :  { %1915 = vmatpush1.bf16.msra.mxu1 %v2647_v16 }
 0x261   :  { %1917 = vmatmul.mubr.bf16.vlgmr.msra.gmra.mrb[0].mxu1 %v2986_v6  ;;  %v3012_v6 = vrot.slane %v1270_v58, %v382_v49 }
 0x262   :  { %1926 = vmatprep.mubr.bf16.mxu1 %v1167_v54 }
 0x269   :  { %1927 = vmatmul.mubr.bf16.gmra.mrb[4].mxu1 %v1165_v30 }
 0x26a   :  { %1936 = vmatprep.mubr.bf16.mxu1 %v1166_v18 }
 0x271   :  { %1937 = vmatmul.mubr.bf16.gmra.mrb[8].mxu1 %v1164_v27 }
 0x334   :  { %v1918_v38 = vpop.f32.mrb[0].mxu1 }
 0x335   :  { %v2295_v49 = vadd.f32 %v1918_v38, %v3012_v6  ;;  %v1920_v17 = vpop.f32.mrb[1].mxu1 }
 0x336   :  { %v2296_v53 = vadd.f32 %v1920_v17, %v3018_v29  ;;  %v1922_v39 = vpop.f32.mrb[2].mxu1 }
 0x337   :  { %v1945_v51 = vmul.f32 %v2295_v49, %v2927_v4  ;;  %v2297_v57 = vadd.f32 %v1922_v39, %v3012_v6  ;;  %v1924_v26 = vpop.f32.mrb[3].mxu1 }
 0x338   :  { %v1946_v40 = vmul.f32 %v2296_v53, %v2927_v4  ;;  %v2298_v41 = vadd.f32 %v1924_v26, %v3018_v29 }
 0x339   :  { %v1994_v60 = vadd.f32 %v1968_v52, %v1945_v51  ;;  %v1996_v21 = vadd.f32 %v2297_v57, %v1973_v48 }
 0x33a   :  { %v1995_v50 = vadd.f32 %v1971_v3, %v1946_v40  ;;  %v1997_v59 = vadd.f32 %v2298_v41, %v1975_v56 }
 0x33b   :  { %v2004_v61 = vmax.f32 %v1994_v60, 0.0  ;;  %v2006_v62 = vmax.f32 %v1996_v21, 0.0 }
 0x33c   :  { %v2005_v42 = vmax.f32 %v1995_v50, 0.0  ;;  %v2007_v1 = vmax.f32 %v1997_v59, 0.0  ;;  %v1928_v23 = vpop.f32.mrb[4].mxu1 }
 0x33d   :  { %v2014_v46 = vmul.f32 %v2927_v4, %v2004_v61  ;;  %v2299_v5 = vadd.f32 %v1928_v23, %v3012_v6  ;;  %v1930_v2 = vpop.f32.mrb[5].mxu1  ;;  %v2031_v0 = vrot.slane %v2006_v62, 1 }
 0x33e   :  { %v2015_v7 = vmul.f32 %v2927_v4, %v2005_v42  ;;  %v2300_v55 = vadd.f32 %v1930_v2, %v3018_v29  ;;  %v1932_v8 = vpop.f32.mrb[6].mxu1  ;;  %v2034_v14 = vrot.slane %v2007_v1, 1 }
 0x33f   :  { %v2030_v10 = vrot.slane %v2014_v46, 1  ;;  %v1949_v11 = vmul.f32 %v2299_v5, %v2943_v32  ;;  %v2301_v12 = vadd.f32 %v1932_v8, %v3012_v6  ;;  %v1934_v13 = vpop.f32.mrb[7].mxu1 }
 0x340   :  { %v2033_v24 = vrot.slane %v2015_v7, 1  ;;  %v1950_v15 = vmul.f32 %v2300_v55, %v2943_v32  ;;  %v2302_v4 = vadd.f32 %v1934_v13, %v3018_v29 }
 0x341   :  { %v2032_v16 = vsel %vm265_vm3, %v2030_v10, %v2031_v0  ;;  %v1998_v18 = vadd.f32 %v1977_v37, %v1949_v11  ;;  %v2000_v19 = vadd.f32 %v2301_v12, %v1981_v20 }
 0x342   :  { %2044 = vst [vmem:[#allocation9] sm:$0xff] %v2032_v16  ;;  %v2035_v22 = vsel %vm265_vm3, %v2033_v24, %v2034_v14  ;;  %v1999_v54 = vadd.f32 %v1979_v63, %v1950_v15  ;;  %v2001_v27 = vadd.f32 %v2302_v4, %v1983_v9 }
 0x343   :  { %2045 = vst [vmem:[#allocation9 + $0x8] sm:$0xff] %v2035_v22  ;;  %v2008_v30 = vmax.f32 %v1998_v18, 0.0  ;;  %v2010_v58 = vmax.f32 %v2000_v19, 0.0 }
 0x344   :  { %v2009_v25 = vmax.f32 %v1999_v54, 0.0  ;;  %v2011_v33 = vmax.f32 %v2001_v27, 0.0  ;;  %v1938_v31 = vpop.f32.mrb[8].mxu1 }
 0x345   :  { %v2018_v28 = vmul.f32 %v2943_v32, %v2008_v30  ;;  %v2303_v35 = vadd.f32 %v1938_v31, %v3012_v6  ;;  %v1940_v36 = vpop.f32.mrb[9].mxu1  ;;  %v2054_v39 = vrot.slane %v2010_v58, 3 }
 0x346   :  { %v2019_v38 = vmul.f32 %v2943_v32, %v2009_v25  ;;  %v2304_v49 = vadd.f32 %v1940_v36, %v3018_v29  ;;  %v1942_v17 = vpop.f32.mrb[10].mxu1  ;;  %v2057_v26 = vrot.slane %v2011_v33, 3 }
 0x347   :  { %v2036_v52 = vrot.slane %v2018_v28, 1  ;;  %v2053_v53 = vrot.slane %v2018_v28, 3  ;;  %v1953_v48 = vmul.f32 %v2303_v35, %v2953_v44  ;;  %v1943_v51 = vpop.f32.mrb[11].mxu1 }
 0x348   :  { %v2038_v3 = vrot.slane %v2019_v38, 1  ;;  %v2056_v57 = vrot.slane %v2019_v38, 3  ;;  %v1954_v56 = vmul.f32 %v2304_v49, %v2953_v44 }
 0x349   :  { %v2037_v6 = vsel %vm265_vm3, %v2031_v0, %v2036_v52  ;;  %v2055_v40 = vsel %vm2052_vm10, %v2053_v53, %v2054_v39  ;;  %v2002_v32 = vadd.f32 %v1980_v45, %v1953_v48 }
 0x34a   :  { %2046 = vst [vmem:[#allocation9 + $0x10] sm:$0xff] %v2037_v6  ;;  %v2039_v29 = vsel %vm265_vm3, %v2034_v14, %v2038_v3  ;;  %2068 = vst [vmem:[#allocation9 + $0x20] sm:$0xff] %v2055_v40  ;;  %v2058_v41 = vsel %vm2052_vm10, %v2056_v57, %v2057_v26  ;;  %v2003_v60 = vadd.f32 %v1982_v43, %v1954_v56 }
 0x34b   :  { %2047 = vst [vmem:[#allocation9 + $0x18] sm:$0xff] %v2039_v29  ;;  %2069 = vst [vmem:[#allocation9 + $0x28] sm:$0xff] %v2058_v41  ;;  %v2012_v21 = vmax.f32 %v2002_v32, 0.0 }
 0x34c   :  { %v2013_v47 = vmax.f32 %v2003_v60, 0.0 }
 0x34d   :  { %v2022_v50 = vmul.f32 %v2953_v44, %v2012_v21 }
 0x34e   :  { %v2023_v59 = vmul.f32 %v2953_v44, %v2013_v47 }
 0x34f   :  { %v2059_v34 = vrot.slane %v2022_v50, 3 }
 0x350   :  { %v2061_v61 = vrot.slane %v2023_v59, 3 }
 0x351   :  { %v2060_v45 = vsel %vm2052_vm10, %v2054_v39, %v2059_v34 }
 0x352   :  { %2070 = vst [vmem:[#allocation9 + $0x30] sm:$0xff] %v2060_v45  ;;  %v2062_v62 = vsel %vm2052_vm10, %v2057_v26, %v2061_v61 }
 0x353   :  { %2071 = vst [vmem:[#allocation9 + $0x38] sm:$0xff] %v2062_v62 }
 0x354   :  { %2727 = shalt.err (!%p2724_p0)
}
 0x355   :  { %s2728_s12 = scalar_lea.hbm %s3086_s5, 1024 }
 0x356   :  { %p2729_p1 = scmp.ne.s32.totalorder %s3086_s5, %s2728_s12  ;;  %p2732_p2 = scmp.lt.u32.totalorder %s2728_s12, %s3086_s5 }
 0x358   :  { %p2734_p3 = pnand %p2732_p2, %p2729_p1 }
 0x35a   :  { %2737 = shalt.err (!%p2734_p3)
}
 0x35b   :  { %2083 = dma.vmem_to_hbm [thread:$0]  %s2078_s8, 1024, %s3086_s5, [#allocation5], %s2748_s1, %s2748_s1, %s2749_s17  }
 0x35c   :  { %2742 = dma.done.wait [#allocation5], 1024  }
 0x35d   :  { %2743 = vsyncadd [#allocation5], 4294966272 }
 0x35e   :  { %2087 = vsyncpa [#allocation4], 1 }
 0x35f   :  { %2088 = vsyncpa [#allocation7], 1 }
 0x360   :  { %2089 = vsyncpa [#allocation5], 1 }

</bundles_post_ra>
